<compile_context>
chip_gen: v7x
topology: tpu7x:2x2x1
jax: 0.10.0
libtpu: 0.0.40
codegen_flags: <defaults>
</compile_context>

<pallas_src>
import jax
import jax.numpy as jnp
import numpy as np
from jax.experimental import pallas as pl
from jax.experimental.pallas import tpu as pltpu


def _attn_pool_kernel(x_ref, pos_ref, wq_ref, bq_ref, wk_ref, bk_ref,
                      wv_ref, bv_ref, wc_ref, bc_ref, o_ref, x2_ref):
    # x_ref: (BB, N, C) f32           pos_ref: (N, C) f32
    # wq/wk/wv_ref: (1, C, Dh) bf16   bq/bk/bv_ref: (1, 1, Dh) f32
    # wc_ref: (1, Dh, O) bf16         bc_ref: (1, O) f32
    # o_ref: (BB, N, O) f32  (resident across the head axis -> accumulator)
    # x2_ref: (BB*N, C) bf16 scratch  (x + pos, computed once per batch block)
    h = pl.program_id(1)
    BB, N, C = x_ref.shape
    Dh = wq_ref.shape[-1]
    O = o_ref.shape[-1]

    @pl.when(h == 0)
    def _():
        # positional add in f32 once per batch block, cached in bf16 for the MXU
        x = x_ref[...] + pos_ref[...]                     # broadcast over BB
        x2_ref[...] = x.reshape(BB * N, C).astype(jnp.bfloat16)
        # seed the output accumulator with the out-projection bias
        o_ref[...] = jnp.broadcast_to(
            bc_ref[...].reshape(1, 1, O), (BB, N, O)).astype(o_ref.dtype)

    x2 = x2_ref[...]                                      # (BB*N, C) bf16

    # per-head projections: (BB*N, C) @ (C, Dh), f32 accumulation (K = full C).
    # softmax scale is already folded into wq / bq.
    q = jnp.dot(x2, wq_ref[0], preferred_element_type=jnp.float32) + bq_ref[0]
    k = jnp.dot(x2, wk_ref[0], preferred_element_type=jnp.float32) + bk_ref[0]
    v = jnp.dot(x2, wv_ref[0], preferred_element_type=jnp.float32) + bv_ref[0]

    q3 = q.reshape(BB, N, Dh).astype(jnp.bfloat16)
    k3 = k.reshape(BB, N, Dh).astype(jnp.bfloat16)
    v3 = v.reshape(BB, N, Dh).astype(jnp.bfloat16)

    # batched attention over the BB batch elements of this block (head = grid step)
    s = jnp.einsum("bnd,bmd->bnm", q3, k3,
                   preferred_element_type=jnp.float32)    # (BB, N, N) f32
    s = s - jnp.max(s, axis=-1, keepdims=True)
    p = jnp.exp(s)
    p = p * pl.reciprocal(jnp.sum(p, axis=-1, keepdims=True), approx=True)
    oh = jnp.einsum("bnm,bmd->bnd", p.astype(jnp.bfloat16), v3,
                    preferred_element_type=jnp.float32)   # (BB, N, Dh) f32

    # this head's slice of the output projection, accumulated in f32 in o_ref
    o_ref[...] += jnp.dot(
        oh.reshape(BB * N, Dh).astype(jnp.bfloat16), wc_ref[0],
        preferred_element_type=jnp.float32).reshape(BB, N, O)


def _pick_batch_block(B, N, max_rows=256):
    """Largest divisor of B with BB*N <= max_rows, keeping >=2 parallel grid steps."""
    bb = 1
    for c in range(1, B + 1):
        if B % c == 0 and c * N <= max_rows:
            bb = c
    if B // bb < 2:  # leave >=2 blocks on the parallel axis (megacore) if possible
        for c in range(bb - 1, 0, -1):
            if B % c == 0:
                bb = c
                break
    return bb


def attention_pool2d(x, params, num_heads, *, batch_block=None):
    """x: (B, N, C) float32 -> (B, output_dim, N) float32, matching PyTorch."""
    B, N, C = x.shape
    H = num_heads
    Dh = C // H
    O = params["wc"].shape[0]
    scale = 1.0 / float(Dh) ** 0.5

    pos = params["pos"][:N].astype(jnp.float32)                           # (N, C)

    # Contraction-ready, head-tiled weights (no transposes inside the kernel):
    #   q = x @ Wq.T  ->  per-head slab Wq_h[c, d] = Wq[h*Dh + d, c]
    # softmax scale folded into Wq / bq (q_scaled = x @ (scale*Wq.T) + scale*bq)
    wq_h = (params["wq"].reshape(H, Dh, C).transpose(0, 2, 1) * scale).astype(jnp.bfloat16)
    wk_h = params["wk"].reshape(H, Dh, C).transpose(0, 2, 1).astype(jnp.bfloat16)
    wv_h = params["wv"].reshape(H, Dh, C).transpose(0, 2, 1).astype(jnp.bfloat16)
    wc_h = params["wc"].T.reshape(H, Dh, O).astype(jnp.bfloat16)          # (H, Dh, O)
    bq_h = (params["bq"] * scale).reshape(H, 1, Dh).astype(jnp.float32)
    bk_h = params["bk"].reshape(H, 1, Dh).astype(jnp.float32)
    bv_h = params["bv"].reshape(H, 1, Dh).astype(jnp.float32)
    bc = params["bc"].reshape(1, O).astype(jnp.float32)

    BB = batch_block or _pick_batch_block(B, N)
    assert B % BB == 0

    # Scoped-VMEM limit sized to the per-step resident set (double-buffered inputs),
    # clamped to stay under the v7x 64 MiB physical VMEM.
    resident = (2 * BB * N * C * 4                 # x block (f32)
                + 2 * N * C * 4                    # positional embedding
                + 2 * 3 * (C * Dh * 2 + Dh * 4)    # Wq/Wk/Wv head tiles + biases
                + 2 * (Dh * O * 2 + O * 4)         # Wc head tile + bias
                + 2 * BB * N * O * 4               # output block (f32 accumulator)
                + BB * N * C * 2)                  # bf16 x+pos scratch
    vmem_limit = int(min(max(4 * resident, 32 * 1024 * 1024), 60 * 1024 * 1024))

    out_bno = pl.pallas_call(
        _attn_pool_kernel,
        out_shape=jax.ShapeDtypeStruct((B, N, O), jnp.float32),
        grid=(B // BB, H),                                   # heads = inner reduction axis
        in_specs=[
            pl.BlockSpec((BB, N, C), lambda b, h: (b, 0, 0)),    # x (resident across heads)
            pl.BlockSpec((N, C), lambda b, h: (0, 0)),           # positional embedding
            pl.BlockSpec((1, C, Dh), lambda b, h: (h, 0, 0)),    # Wq head tile
            pl.BlockSpec((1, 1, Dh), lambda b, h: (h, 0, 0)),    # bq head tile
            pl.BlockSpec((1, C, Dh), lambda b, h: (h, 0, 0)),    # Wk head tile
            pl.BlockSpec((1, 1, Dh), lambda b, h: (h, 0, 0)),    # bk head tile
            pl.BlockSpec((1, C, Dh), lambda b, h: (h, 0, 0)),    # Wv head tile
            pl.BlockSpec((1, 1, Dh), lambda b, h: (h, 0, 0)),    # bv head tile
            pl.BlockSpec((1, Dh, O), lambda b, h: (h, 0, 0)),    # Wc head tile
            pl.BlockSpec((1, O), lambda b, h: (0, 0)),           # bc
        ],
        out_specs=pl.BlockSpec((BB, N, O), lambda b, h: (b, 0, 0)),
        scratch_shapes=[pltpu.VMEM((BB * N, C), jnp.bfloat16)],
        compiler_params=pltpu.CompilerParams(
            dimension_semantics=("parallel", "arbitrary"),
            vmem_limit_bytes=vmem_limit),
    )(x.astype(jnp.float32), pos, wq_h, bq_h, wk_h, bk_h, wv_h, bv_h, wc_h, bc)

    # N < 128 here, so keep the kernel output lane-dense on O and transpose once
    # in the wrapper (PyTorch returns (B, O, N)).  For N >= 128 the transposed
    # layout could be emitted directly from the kernel instead.
    return jnp.transpose(out_bno, (0, 2, 1))


def attention_pool2d_reference(x, params, num_heads):
    """Pure-JAX f32 replica of the F.multi_head_attention_forward path."""
    B, N, C = x.shape
    head_dim = C // num_heads
    pos = params["pos"][:N]
    xt = jnp.transpose(x, (1, 0, 2)) + pos[:, None, :]              # (N, B, C)
    q = xt @ params["wq"].T + params["bq"]
    k = xt @ params["wk"].T + params["bk"]
    v = xt @ params["wv"].T + params["bv"]

    def split(t):
        return jnp.transpose(t.reshape(N, B, num_heads, head_dim), (1, 2, 0, 3))

    qh = split(q) * (1.0 / float(head_dim) ** 0.5)
    kh, vh = split(k), split(v)
    s = jnp.einsum("bhnd,bhmd->bhnm", qh, kh)
    p = jax.nn.softmax(s, axis=-1)
    o = jnp.einsum("bhnm,bhmd->bhnd", p, vh)                        # (B, H, N, Dh)
    o = jnp.transpose(o, (2, 0, 1, 3)).reshape(N, B, C)
    o = o @ params["wc"].T + params["bc"]                           # (N, B, O)
    return jnp.transpose(o, (1, 2, 0))                              # (B, O, N)


def make_params(key, spacial_dim, embed_dim, output_dim):
    ks = jax.random.split(key, 9)
    scale = 1.0 / float(embed_dim) ** 0.5
    return {
        "pos": jax.random.normal(ks[0], (spacial_dim, embed_dim), jnp.float32) * scale,
        "wq": jax.random.normal(ks[1], (embed_dim, embed_dim), jnp.float32) * scale,
        "bq": jax.random.normal(ks[2], (embed_dim,), jnp.float32) * 0.1,
        "wk": jax.random.normal(ks[3], (embed_dim, embed_dim), jnp.float32) * scale,
        "bk": jax.random.normal(ks[4], (embed_dim,), jnp.float32) * 0.1,
        "wv": jax.random.normal(ks[5], (embed_dim, embed_dim), jnp.float32) * scale,
        "bv": jax.random.normal(ks[6], (embed_dim,), jnp.float32) * 0.1,
        "wc": jax.random.normal(ks[7], (output_dim, embed_dim), jnp.float32) * scale,
        "bc": jax.random.normal(ks[8], (output_dim,), jnp.float32) * 0.1,
    }


if __name__ == "__main__":
    # small but TPU-friendly shapes: lane-dense O (=128), BB*N = 128 rows per step
    B, N = 16, 16
    spacial_dim, embed_dim, num_heads, output_dim = 16, 64, 4, 128

    key = jax.random.PRNGKey(0)
    kx, kp = jax.random.split(key)
    x = jax.random.normal(kx, (B, N, embed_dim), jnp.float32)
    params = make_params(kp, spacial_dim, embed_dim, output_dim)

    out = jax.block_until_ready(attention_pool2d(x, params, num_heads))
    ref = jax.block_until_ready(attention_pool2d_reference(x, params, num_heads))
    assert out.shape == (B, output_dim, N), out.shape
    # bf16 MXU operands (f32 accumulation) + approx reciprocal -> loose tolerance vs f32 ref
    np.testing.assert_allclose(np.asarray(out), np.asarray(ref), rtol=5e-2, atol=1e-1)
    print("KERNEL_OK")
</pallas_src>

<mosaic_0001>
module attributes {stable_mosaic.version = 11 : i64} {
  func.func @_attn_pool_kernel(%arg0: i32, %arg1: i32, %arg2: memref<8x16x64xf32, #tpu.memory_space<vmem>>, %arg3: memref<16x64xf32, #tpu.memory_space<vmem>>, %arg4: memref<1x64x16xbf16, #tpu.memory_space<vmem>>, %arg5: memref<1x1x16xf32, #tpu.memory_space<vmem>>, %arg6: memref<1x64x16xbf16, #tpu.memory_space<vmem>>, %arg7: memref<1x1x16xf32, #tpu.memory_space<vmem>>, %arg8: memref<1x64x16xbf16, #tpu.memory_space<vmem>>, %arg9: memref<1x1x16xf32, #tpu.memory_space<vmem>>, %arg10: memref<1x16x128xbf16, #tpu.memory_space<vmem>>, %arg11: memref<1x128xf32, #tpu.memory_space<vmem>>, %arg12: memref<8x16x128xf32, #tpu.memory_space<vmem>>, %arg13: memref<128x64xbf16, #tpu.memory_space<vmem>>) attributes {dimension_semantics = [#tpu.dimension_semantics<parallel>, #tpu.dimension_semantics<arbitrary>], iteration_bounds = array<i64: 2, 4>, scalar_prefetch = 0 : i64, scratch_operands = 1 : i64, tpu.core_type = #tpu.core_type<tc>, window_params = [{transform_indices = @transform_0, window_bounds = array<i64: 8, 16, 64>}, {pipeline_mode = #tpu.pipeline_mode<synchronous>, transform_indices = @transform_1, window_bounds = array<i64: 16, 64>}, {transform_indices = @transform_2, window_bounds = array<i64: 1, 64, 16>}, {transform_indices = @transform_3, window_bounds = array<i64: 1, 1, 16>}, {transform_indices = @transform_4, window_bounds = array<i64: 1, 64, 16>}, {transform_indices = @transform_5, window_bounds = array<i64: 1, 1, 16>}, {transform_indices = @transform_6, window_bounds = array<i64: 1, 64, 16>}, {transform_indices = @transform_7, window_bounds = array<i64: 1, 1, 16>}, {transform_indices = @transform_8, window_bounds = array<i64: 1, 16, 128>}, {pipeline_mode = #tpu.pipeline_mode<synchronous>, transform_indices = @transform_9, window_bounds = array<i64: 1, 128>}, {transform_indices = @transform_10, window_bounds = array<i64: 8, 16, 128>}]} {
    %c0_i32 = arith.constant 0 : i32
    %0 = arith.cmpi eq, %arg1, %c0_i32 : i32
    %1 = arith.extui %0 : i1 to i32
    %c0_i32_0 = arith.constant 0 : i32
    %2 = arith.cmpi ne, %1, %c0_i32_0 : i32
    scf.if %2 {
      %c0_36 = arith.constant 0 : index
      %c0_37 = arith.constant 0 : index
      %c0_38 = arith.constant 0 : index
      %53 = vector.load %arg2[%c0_36, %c0_37, %c0_38] : memref<8x16x64xf32, #tpu.memory_space<vmem>>, vector<8x16x64xf32>
      %c0_39 = arith.constant 0 : index
      %c0_40 = arith.constant 0 : index
      %54 = vector.load %arg3[%c0_39, %c0_40] : memref<16x64xf32, #tpu.memory_space<vmem>>, vector<16x64xf32>
      %55 = vector.shape_cast %54 : vector<16x64xf32> to vector<1x16x64xf32>
      %56 = vector.broadcast %55 : vector<1x16x64xf32> to vector<8x16x64xf32>
      %57 = arith.addf %53, %56 : vector<8x16x64xf32>
      %58 = vector.shape_cast %57 : vector<8x16x64xf32> to vector<128x64xf32>
      %59 = arith.truncf %58 : vector<128x64xf32> to vector<128x64xbf16>
      %c0_41 = arith.constant 0 : index
      %c0_42 = arith.constant 0 : index
      %60 = vector.load %arg13[%c0_41, %c0_42] : memref<128x64xbf16, #tpu.memory_space<vmem>>, vector<128x64xbf16>
      tpu.vector_store %arg13[%c0_41, %c0_42], %59 {strides = array<i32>} : memref<128x64xbf16, #tpu.memory_space<vmem>>, vector<128x64xbf16>,
      %c0_43 = arith.constant 0 : index
      %c0_44 = arith.constant 0 : index
      %61 = vector.load %arg11[%c0_43, %c0_44] : memref<1x128xf32, #tpu.memory_space<vmem>>, vector<1x128xf32>
      %62 = vector.shape_cast %61 : vector<1x128xf32> to vector<1x1x128xf32>
      %63 = vector.shape_cast %62 : vector<1x1x128xf32> to vector<1x1x128xf32>
      %64 = vector.broadcast %63 : vector<1x1x128xf32> to vector<8x16x128xf32>
      %c0_45 = arith.constant 0 : index
      %c0_46 = arith.constant 0 : index
      %c0_47 = arith.constant 0 : index
      %65 = vector.load %arg12[%c0_45, %c0_46, %c0_47] : memref<8x16x128xf32, #tpu.memory_space<vmem>>, vector<8x16x128xf32>
      tpu.vector_store %arg12[%c0_45, %c0_46, %c0_47], %64 {strides = array<i32>} : memref<8x16x128xf32, #tpu.memory_space<vmem>>, vector<8x16x128xf32>,
    } else {
    }
    %c0 = arith.constant 0 : index
    %c0_1 = arith.constant 0 : index
    %3 = vector.load %arg13[%c0, %c0_1] : memref<128x64xbf16, #tpu.memory_space<vmem>>, vector<128x64xbf16>
    %c0_2 = arith.constant 0 : index
    %c0_3 = arith.constant 0 : index
    %c0_4 = arith.constant 0 : index
    %4 = vector.load %arg4[%c0_2, %c0_3, %c0_4] : memref<1x64x16xbf16, #tpu.memory_space<vmem>>, vector<1x64x16xbf16>
    %5 = vector.shape_cast %4 : vector<1x64x16xbf16> to vector<64x16xbf16>
    %cst = arith.constant dense<0.000000e+00> : vector<128x16xf32>
    %6 = tpu.matmul %3, %5, %cst {dimension_numbers = #tpu.dot_dimension_numbers<[1], [0], [0], [1], [0, 0, 1, 1], [], []>} : vector<128x64xbf16>, vector<64x16xbf16>, vector<128x16xf32> -> vector<128x16xf32>
    %c0_5 = arith.constant 0 : index
    %c0_6 = arith.constant 0 : index
    %c0_7 = arith.constant 0 : index
    %7 = vector.load %arg5[%c0_5, %c0_6, %c0_7] : memref<1x1x16xf32, #tpu.memory_space<vmem>>, vector<1x1x16xf32>
    %8 = vector.shape_cast %7 : vector<1x1x16xf32> to vector<1x16xf32>
    %9 = vector.broadcast %8 : vector<1x16xf32> to vector<128x16xf32>
    %10 = arith.addf %6, %9 : vector<128x16xf32>
    %c0_8 = arith.constant 0 : index
    %c0_9 = arith.constant 0 : index
    %c0_10 = arith.constant 0 : index
    %11 = vector.load %arg6[%c0_8, %c0_9, %c0_10] : memref<1x64x16xbf16, #tpu.memory_space<vmem>>, vector<1x64x16xbf16>
    %12 = vector.shape_cast %11 : vector<1x64x16xbf16> to vector<64x16xbf16>
    %cst_11 = arith.constant dense<0.000000e+00> : vector<128x16xf32>
    %13 = tpu.matmul %3, %12, %cst_11 {dimension_numbers = #tpu.dot_dimension_numbers<[1], [0], [0], [1], [0, 0, 1, 1], [], []>} : vector<128x64xbf16>, vector<64x16xbf16>, vector<128x16xf32> -> vector<128x16xf32>
    %c0_12 = arith.constant 0 : index
    %c0_13 = arith.constant 0 : index
    %c0_14 = arith.constant 0 : index
    %14 = vector.load %arg7[%c0_12, %c0_13, %c0_14] : memref<1x1x16xf32, #tpu.memory_space<vmem>>, vector<1x1x16xf32>
    %15 = vector.shape_cast %14 : vector<1x1x16xf32> to vector<1x16xf32>
    %16 = vector.broadcast %15 : vector<1x16xf32> to vector<128x16xf32>
    %17 = arith.addf %13, %16 : vector<128x16xf32>
    %c0_15 = arith.constant 0 : index
    %c0_16 = arith.constant 0 : index
    %c0_17 = arith.constant 0 : index
    %18 = vector.load %arg8[%c0_15, %c0_16, %c0_17] : memref<1x64x16xbf16, #tpu.memory_space<vmem>>, vector<1x64x16xbf16>
    %19 = vector.shape_cast %18 : vector<1x64x16xbf16> to vector<64x16xbf16>
    %cst_18 = arith.constant dense<0.000000e+00> : vector<128x16xf32>
    %20 = tpu.matmul %3, %19, %cst_18 {dimension_numbers = #tpu.dot_dimension_numbers<[1], [0], [0], [1], [0, 0, 1, 1], [], []>} : vector<128x64xbf16>, vector<64x16xbf16>, vector<128x16xf32> -> vector<128x16xf32>
    %c0_19 = arith.constant 0 : index
    %c0_20 = arith.constant 0 : index
    %c0_21 = arith.constant 0 : index
    %21 = vector.load %arg9[%c0_19, %c0_20, %c0_21] : memref<1x1x16xf32, #tpu.memory_space<vmem>>, vector<1x1x16xf32>
    %22 = vector.shape_cast %21 : vector<1x1x16xf32> to vector<1x16xf32>
    %23 = vector.broadcast %22 : vector<1x16xf32> to vector<128x16xf32>
    %24 = arith.addf %20, %23 : vector<128x16xf32>
    %25 = vector.shape_cast %10 : vector<128x16xf32> to vector<8x16x16xf32>
    %26 = arith.truncf %25 : vector<8x16x16xf32> to vector<8x16x16xbf16>
    %27 = vector.shape_cast %17 : vector<128x16xf32> to vector<8x16x16xf32>
    %28 = arith.truncf %27 : vector<8x16x16xf32> to vector<8x16x16xbf16>
    %29 = vector.shape_cast %24 : vector<128x16xf32> to vector<8x16x16xf32>
    %30 = arith.truncf %29 : vector<8x16x16xf32> to vector<8x16x16xbf16>
    "tpu.trace_start"() <{level = 10 : i32, message = "bnd,bmd->bnm"}> : () -> ()
    %cst_22 = arith.constant dense<0.000000e+00> : vector<8x16x16xf32>
    %31 = tpu.matmul %26, %28, %cst_22 {dimension_numbers = #tpu.dot_dimension_numbers<[2], [2], [1], [1], [0, 0, 0, 1, 1, 1], [0], [0]>} : vector<8x16x16xbf16>, vector<8x16x16xbf16>, vector<8x16x16xf32> -> vector<8x16x16xf32>
    "tpu.trace_stop"() : () -> ()
    %cst_23 = arith.constant dense<0xFF800000> : vector<8x16xf32>
    %32 = vector.multi_reduction <maximumf>, %31, %cst_23 [2] : vector<8x16x16xf32> to vector<8x16xf32>
    %33 = vector.shape_cast %32 : vector<8x16xf32> to vector<8x16x1xf32>
    %34 = vector.broadcast %33 : vector<8x16x1xf32> to vector<8x16x16xf32>
    %35 = arith.subf %31, %34 : vector<8x16x16xf32>
    %36 = math.exp %35 : vector<8x16x16xf32>
    %cst_24 = arith.constant dense<0.000000e+00> : vector<8x16xf32>
    %37 = vector.multi_reduction <add>, %36, %cst_24 [2] : vector<8x16x16xf32> to vector<8x16xf32>
    %38 = vector.shape_cast %37 : vector<8x16xf32> to vector<8x16x1xf32>
    %39 = tpu.reciprocal %38 {approx = true} : vector<8x16x1xf32> -> vector<8x16x1xf32>
    %40 = vector.broadcast %39 : vector<8x16x1xf32> to vector<8x16x16xf32>
    %41 = arith.mulf %36, %40 : vector<8x16x16xf32>
    %42 = arith.truncf %41 : vector<8x16x16xf32> to vector<8x16x16xbf16>
    "tpu.trace_start"() <{level = 10 : i32, message = "bnm,bmd->bnd"}> : () -> ()
    %cst_25 = arith.constant dense<0.000000e+00> : vector<8x16x16xf32>
    %43 = tpu.matmul %42, %30, %cst_25 {dimension_numbers = #tpu.dot_dimension_numbers<[2], [1], [1], [2], [0, 0, 0, 1, 1, 2], [0], [0]>} : vector<8x16x16xbf16>, vector<8x16x16xbf16>, vector<8x16x16xf32> -> vector<8x16x16xf32>
    "tpu.trace_stop"() : () -> ()
    %c0_26 = arith.constant 0 : index
    %c0_27 = arith.constant 0 : index
    %c0_28 = arith.constant 0 : index
    %44 = vector.load %arg12[%c0_26, %c0_27, %c0_28] : memref<8x16x128xf32, #tpu.memory_space<vmem>>, vector<8x16x128xf32>
    %45 = vector.shape_cast %43 : vector<8x16x16xf32> to vector<128x16xf32>
    %46 = arith.truncf %45 : vector<128x16xf32> to vector<128x16xbf16>
    %c0_29 = arith.constant 0 : index
    %c0_30 = arith.constant 0 : index
    %c0_31 = arith.constant 0 : index
    %47 = vector.load %arg10[%c0_29, %c0_30, %c0_31] : memref<1x16x128xbf16, #tpu.memory_space<vmem>>, vector<1x16x128xbf16>
    %48 = vector.shape_cast %47 : vector<1x16x128xbf16> to vector<16x128xbf16>
    %cst_32 = arith.constant dense<0.000000e+00> : vector<128x128xf32>
    %49 = tpu.matmul %46, %48, %cst_32 {dimension_numbers = #tpu.dot_dimension_numbers<[1], [0], [0], [1], [0, 0, 1, 1], [], []>} : vector<128x16xbf16>, vector<16x128xbf16>, vector<128x128xf32> -> vector<128x128xf32>
    %50 = vector.shape_cast %49 : vector<128x128xf32> to vector<8x16x128xf32>
    %51 = arith.addf %44, %50 : vector<8x16x128xf32>
    %c0_33 = arith.constant 0 : index
    %c0_34 = arith.constant 0 : index
    %c0_35 = arith.constant 0 : index
    %52 = vector.load %arg12[%c0_33, %c0_34, %c0_35] : memref<8x16x128xf32, #tpu.memory_space<vmem>>, vector<8x16x128xf32>
    tpu.vector_store %arg12[%c0_33, %c0_34, %c0_35], %51 {strides = array<i32>} : memref<8x16x128xf32, #tpu.memory_space<vmem>>, vector<8x16x128xf32>,
    return
  }
  func.func @transform_0(%arg0: i32, %arg1: i32) -> (i32, i32, i32) {
    %c0_i32 = arith.constant 0 : i32
    %c0_i32_0 = arith.constant 0 : i32
    %c0_i32_1 = arith.constant 0 : i32
    return %arg0, %c0_i32, %c0_i32_0 : i32, i32, i32
  }
  func.func @transform_1(%arg0: i32, %arg1: i32) -> (i32, i32) {
    %c0_i32 = arith.constant 0 : i32
    %c0_i32_0 = arith.constant 0 : i32
    %c0_i32_1 = arith.constant 0 : i32
    return %c0_i32, %c0_i32_0 : i32, i32
  }
  func.func @transform_2(%arg0: i32, %arg1: i32) -> (i32, i32, i32) {
    %c0_i32 = arith.constant 0 : i32
    %c0_i32_0 = arith.constant 0 : i32
    %c0_i32_1 = arith.constant 0 : i32
    return %arg1, %c0_i32, %c0_i32_0 : i32, i32, i32
  }
  func.func @transform_3(%arg0: i32, %arg1: i32) -> (i32, i32, i32) {
    %c0_i32 = arith.constant 0 : i32
    %c0_i32_0 = arith.constant 0 : i32
    %c0_i32_1 = arith.constant 0 : i32
    return %arg1, %c0_i32, %c0_i32_0 : i32, i32, i32
  }
  func.func @transform_4(%arg0: i32, %arg1: i32) -> (i32, i32, i32) {
    %c0_i32 = arith.constant 0 : i32
    %c0_i32_0 = arith.constant 0 : i32
    %c0_i32_1 = arith.constant 0 : i32
    return %arg1, %c0_i32, %c0_i32_0 : i32, i32, i32
  }
  func.func @transform_5(%arg0: i32, %arg1: i32) -> (i32, i32, i32) {
    %c0_i32 = arith.constant 0 : i32
    %c0_i32_0 = arith.constant 0 : i32
    %c0_i32_1 = arith.constant 0 : i32
    return %arg1, %c0_i32, %c0_i32_0 : i32, i32, i32
  }
  func.func @transform_6(%arg0: i32, %arg1: i32) -> (i32, i32, i32) {
    %c0_i32 = arith.constant 0 : i32
    %c0_i32_0 = arith.constant 0 : i32
    %c0_i32_1 = arith.constant 0 : i32
    return %arg1, %c0_i32, %c0_i32_0 : i32, i32, i32
  }
  func.func @transform_7(%arg0: i32, %arg1: i32) -> (i32, i32, i32) {
    %c0_i32 = arith.constant 0 : i32
    %c0_i32_0 = arith.constant 0 : i32
    %c0_i32_1 = arith.constant 0 : i32
    return %arg1, %c0_i32, %c0_i32_0 : i32, i32, i32
  }
  func.func @transform_8(%arg0: i32, %arg1: i32) -> (i32, i32, i32) {
    %c0_i32 = arith.constant 0 : i32
    %c0_i32_0 = arith.constant 0 : i32
    %c0_i32_1 = arith.constant 0 : i32
    return %arg1, %c0_i32, %c0_i32_0 : i32, i32, i32
  }
  func.func @transform_9(%arg0: i32, %arg1: i32) -> (i32, i32) {
    %c0_i32 = arith.constant 0 : i32
    %c0_i32_0 = arith.constant 0 : i32
    %c0_i32_1 = arith.constant 0 : i32
    return %c0_i32, %c0_i32_0 : i32, i32
  }
  func.func @transform_10(%arg0: i32, %arg1: i32) -> (i32, i32, i32) {
    %c0_i32 = arith.constant 0 : i32
    %c0_i32_0 = arith.constant 0 : i32
    %c0_i32_1 = arith.constant 0 : i32
    return %arg0, %c0_i32, %c0_i32_0 : i32, i32, i32
  }
}

</mosaic_0001>

<bundles_post_ra>
// kernel: tpu_custom_call.1
= control target key start
LH: loop header
LB: loop body
LE: loop exit
PB: predicated region body
PF: predicated region fallthrough
CT: control target
= control target key end

     0   :  { %s3652_s0 = inlined_call_operand.vmem [shape: f32[16,16,64], index: 0, kind: input, shape index: {}]   ;;  %s3653_s1 = inlined_call_operand.vmem [shape: f32[16,64], index: 1, kind: input, shape index: {}]   ;;  %s3654_s2 = inlined_call_operand.vmem [shape: bf16[4,64,16], index: 2, kind: input, shape index: {}]   ;;  %s3655_s3 = inlined_call_operand.vmem [shape: f32[4,1,16], index: 3, kind: input, shape index: {}]   ;;  %s3656_s4 = inlined_call_operand.vmem [shape: bf16[4,64,16], index: 4, kind: input, shape index: {}]   ;;  %s3657_s5 = inlined_call_operand.vmem [shape: f32[4,1,16], index: 5, kind: input, shape index: {}]   ;;  %s3658_s6 = inlined_call_operand.vmem [shape: bf16[4,64,16], index: 6, kind: input, shape index: {}]   ;;  %s3659_s7 = inlined_call_operand.vmem [shape: f32[4,1,16], index: 7, kind: input, shape index: {}]   ;;  %s3660_s8 = inlined_call_operand.vmem [shape: bf16[4,16,128], index: 8, kind: input, shape index: {}]   ;;  %s3661_s9 = inlined_call_operand.vmem [shape: f32[1,128], index: 9, kind: input, shape index: {}]   ;;  %s3662_s10 = inlined_call_operand.hbm [shape: f32[16,16,128], index: 10, kind: output, shape index: {}]  }
   0x1   :  { %3675 = sst [smem:[#allocation16_spill]] %s3652_s0 }
   0x2   :  { %3676 = sst [smem:[#allocation17_spill]] %s3654_s2 }
   0x3   :  { %3677 = sst [smem:[#allocation18_spill]] %s3662_s10 }
   0x4   :  { %15 = vsyncpa [#allocation4], 0 }
   0x5   :  { %17 = vsyncpa [#allocation4 + $0x1], 0  ;;  %s2978_s13 = smov 0   ;;  %s2980_s14 = smov 0  }
   0x6   :  { %s2982_s15 = smov 0   ;;  %s2984_s16 = smov 0  }
   0x7   :  { %s2986_s17 = smov 0   ;;  %s2988_s18 = smov 0  }
   0x8   :  { %s2990_s19 = smov 0   ;;  %s2992_s20 = smov 0  }
   0x9 LB: > { %3678 = sst [smem:[#allocation6_spill]] %s2888_s13  ;;  %s2303_s21 = sadd.s32 4294967295, %s2916_s20   ;;  %s2916_s20 = sphi %s2992_s20, %s23_s20   ;;  %s2912_s19 = sphi %s2990_s19, %s3704_s19   ;;  %s2908_s18 = sphi %s2988_s18, %s3703_s18   ;;  %s2904_s17 = sphi %s2986_s17, %s3702_s17   ;;  %s2900_s16 = sphi %s2984_s16, %s3701_s16   ;;  %s2896_s15 = sphi %s2982_s15, %s3700_s15   ;;  %s2892_s14 = sphi %s2980_s14, %s3706_s14   ;;  %s2888_s13 = sphi %s2978_s13, %s3705_s13  }
   0xa   : > { %3679 = sst [smem:[#allocation7_spill]] %s2896_s15  ;;  %s2304_s22 = sadd.s32 4294967294, %s2916_s20  }
   0xb   : > { %3680 = sst [smem:[#allocation8_spill]] %s2908_s18  ;;  %s32_s23 = sadd.s32 1, %s2908_s18 }
   0xc   : > { %3681 = sst [smem:[#allocation9_spill]] %s2912_s19  ;;  %p33_p0 = scmp.ge.s32.totalorder %s32_s23, 4 }
   0xd   : > { %3682 = sst [smem:[#allocation10_spill]] %s2916_s20  ;;  %s35_s24 = sadd.s32 1, %s2912_s19 }
   0xe   : > { %p302_p1 = scmp.ne.s32.totalorder %s2896_s15, %s2892_s14  ;;  %p303_p2 = scmp.eq.s32.totalorder %s2303_s21, 7 }
   0xf   : > { %s3708_s23 = smov (%p33_p0, %s32_s23), 0  ;;  %s3710_s24 = smov (!%p33_p0, %s35_s24), %s2912_s19 }
  0x10   : > { %3683 = sst [smem:[#allocation11_spill]] %s3708_s23  ;;  %p3027_p3 = por %p303_p2, %p302_p1 }
  0x11   : > { %p308_p4 = scmp.ne.s32.totalorder %s2892_s14, %s2888_s13  ;;  %p37_p5 = scmp.ge.s32.totalorder %s3710_s24, 2 }
  0x12   : > { %s3684_s25 = scalar_select %p3027_p3, 1, 0 }
  0x13   : > { %p309_p6 = scmp.eq.s32.totalorder %s2304_s22, 7  ;;  %p2307_p7 = scmp.ge.s32.totalorder %s2916_s20, 1 }
  0x14   : > { %3685 = sst [smem:[#allocation12_spill]] %s3684_s25  ;;  %p393_p8 = scmp.lt.s32.totalorder %s2916_s20, 9 }
  0x15   : > { %s3712_s24 = smov (%p37_p5, %s3710_s24), 0  ;;  %p3037_p9 = por %p309_p6, %p308_p4 }
  0x16   : > { %3686 = sst [smem:[#allocation13_spill]] %s3712_s24  ;;  %p394_p10 = pnand %p2307_p7, %p393_p8 }
  0x17   : > { %s3687_s26 = scalar_select %p3037_p9, 1, 0 }
  0x18   : > { %s289_s27 = ssub.s32 %s2912_s19, %s3712_s24  ;;  %s292_s28 = sadd.s32 1, %s2896_s15 }
  0x19   : > { %3688 = sst [smem:[#allocation14_spill]] %s3687_s26  ;;  %p290_p11 = scmp.eq.s32.totalorder %s289_s27, 0 }
  0x1a   : > { %397 = sbr.rel (%p394_p10) target bundleno = 1329 (0x531), region = 60  ;;  %s3666_s30 = sand.u32 (!%p394_p10), 1, %s2892_s14  }
  0x1b   : > { %s3045_s29 = scalar_select %p290_p11, %s2896_s15, %s292_s28  }
  0x1c   : > { %s2309_s11 = sshll.u32 (!%p394_p10), %s2904_s17, 3  ;;  %s2308_s12 = sshll.u32 (!%p394_p10), %s3666_s30, 7 }
  0x1d   : > { %3689 = sst [smem:[#allocation15_spill]] %s3045_s29  ;;  %p462_p12 = scmp.lt.s32.totalorder (!%p394_p10), %s2309_s11, 15 }
  0x1e   : > { %p468_p13 = scmp.lt.s32.totalorder (!%p394_p10), %s2900_s16, 3  ;;  %s3690_s0 = sld [smem:[#allocation16_spill]] (!%p394_p10) }
  0x1f   : > { %s3691_s2 = sld [smem:[#allocation17_spill]] (!%p394_p10)  ;;  %s3094_s20 = scalar_lea.vmem (!%p394_p10), [#allocation3], %s2308_s12 }
  0x20   : > { %p2320_p0 = scmp.ne.s32.totalorder (!%p394_p10), %s2900_s16, 0 }
  0x21   : > { %s3714_s11 = smov (!%p462_p12, %s2309_s11), 15  ;;  %v519_v2 = vld [vmem:[%s3653_s1] sm:$0xff] (!%p2320_p0)  ;;  %v520_v3 = vld [vmem:[%s3653_s1 + $0x8] sm:$0xff] (!%p2320_p0)  ;;  %vm545_vm0 = vcmask (!%p2320_p0), 523264  }
  0x22   : > { %s3053_s21 = scalar_select %p468_p13, %s2900_s16, 3 }
  0x23   : > { %s2392_s22 = sshll.u32 %s3714_s11, 4  ;;  %502 = sbr.rel (%p2320_p0) target bundleno = 51 (0x33), region = 64  ;;  %v2321_v37 = vld [vmem:[%s3661_s9] ss:$0 sm:$0xff] (!%p2320_p0) }
  0x24   : > { %s3058_s24 = scalar_lea.vmem %s3690_s0, %s2392_s22  ;;  %s2393_s23 = sshll.u32 %s3053_s21, 5  ;;  %561 = vst [vmem:[%s3094_s20] sm:$0xff] (!%p2320_p0), %v2321_v37  ;;  %562 = vst [vmem:[%s3094_s20 + $0x8] sm:$0xff] (!%p2320_p0), %v2321_v37 }
  0x25   : > { %s3064_s30 = scalar_lea.vmem %s3691_s2, %s2393_s23  ;;  %s3073_s10 = scalar_lea.vmem %s3656_s4, %s2393_s23  ;;  %v503_v0 = vld [vmem:[%s3058_s24] sm:$0xff] (!%p2320_p0)  ;;  %v504_v1 = vld [vmem:[%s3058_s24 + $0x8] sm:$0xff] (!%p2320_p0)  ;;  %v505_v5 = vld [vmem:[%s3058_s24 + $0x10] sm:$0xff] (!%p2320_p0)  ;;  %563 = vst [vmem:[%s3094_s20 + $0x10] sm:$0xff] (!%p2320_p0), %v2321_v37 }
  0x26   : > { %s483_s22 = scalar_lea.vmem %s3657_s5, %s3053_s21  ;;  %s3082_s0 = scalar_lea.vmem %s3658_s6, %s2393_s23  ;;  %v521_v4 = vadd.f32 (!%p2320_p0), %v519_v2, %v503_v0  ;;  %v506_v6 = vld [vmem:[%s3058_s24 + $0x18] sm:$0xff] (!%p2320_p0)  ;;  %v522_v7 = vadd.f32 (!%p2320_p0), %v520_v3, %v504_v1  ;;  %v523_v8 = vadd.f32 (!%p2320_p0), %v519_v2, %v505_v5  ;;  %v507_v10 = vld [vmem:[%s3058_s24 + $0x20] sm:$0xff] (!%p2320_p0)  ;;  %v508_v11 = vld [vmem:[%s3058_s24 + $0x28] sm:$0xff] (!%p2320_p0)  ;;  %564 = vst [vmem:[%s3094_s20 + $0x18] sm:$0xff] (!%p2320_p0), %v2321_v37 }
  0x27   : > { %s491_s2 = scalar_lea.vmem %s3659_s7, %s3053_s21  ;;  %s2396_s15 = sshll.u32 %s3053_s21, 3  ;;  %v524_v9 = vadd.f32 (!%p2320_p0), %v520_v3, %v506_v6  ;;  %v509_v12 = vld [vmem:[%s3058_s24 + $0x30] sm:$0xff] (!%p2320_p0)  ;;  %v525_v13 = vadd.f32 (!%p2320_p0), %v519_v2, %v507_v10  ;;  %v526_v14 = vadd.f32 (!%p2320_p0), %v520_v3, %v508_v11  ;;  %v510_v15 = vld [vmem:[%s3058_s24 + $0x38] sm:$0xff] (!%p2320_p0)  ;;  %v511_v17 = vld [vmem:[%s3058_s24 + $0x40] sm:$0xff] (!%p2320_p0)  ;;  %565 = vst [vmem:[%s3094_s20 + $0x20] sm:$0xff] (!%p2320_p0), %v2321_v37 }
  0x28   : > { %s3092_s13 = scalar_lea.vmem %s3660_s8, %s2396_s15  ;;  %v527_v16 = vadd.f32 (!%p2320_p0), %v519_v2, %v509_v12  ;;  %v512_v18 = vld [vmem:[%s3058_s24 + $0x48] sm:$0xff] (!%p2320_p0)  ;;  %v537_v19 = vpack.c.bf16 (!%p2320_p0), %v522_v7, %v521_v4  ;;  %v528_v21 = vadd.f32 (!%p2320_p0), %v520_v3, %v510_v15  ;;  %v529_v22 = vadd.f32 (!%p2320_p0), %v519_v2, %v511_v17  ;;  %v513_v23 = vld [vmem:[%s3058_s24 + $0x50] sm:$0xff] (!%p2320_p0)  ;;  %v514_v24 = vld [vmem:[%s3058_s24 + $0x58] sm:$0xff] (!%p2320_p0)  ;;  %566 = vst [vmem:[%s3094_s20 + $0x28] sm:$0xff] (!%p2320_p0), %v2321_v37 }
  0x29   : > { %v538_v20 = vpack.c.bf16 (!%p2320_p0), %v524_v9, %v523_v8  ;;  %v515_v25 = vld [vmem:[%s3058_s24 + $0x60] sm:$0xff] (!%p2320_p0)  ;;  %v539_v26 = vpack.c.bf16 (!%p2320_p0), %v526_v14, %v525_v13  ;;  %v530_v27 = vadd.f32 (!%p2320_p0), %v520_v3, %v512_v18  ;;  %v531_v28 = vadd.f32 (!%p2320_p0), %v519_v2, %v513_v23  ;;  %v516_v30 = vld [vmem:[%s3058_s24 + $0x68] sm:$0xff] (!%p2320_p0)  ;;  %v517_v31 = vld [vmem:[%s3058_s24 + $0x70] sm:$0xff] (!%p2320_p0)  ;;  %567 = vst [vmem:[%s3094_s20 + $0x30] sm:$0xff] (!%p2320_p0), %v2321_v37 }
  0x2a   : > { %v532_v29 = vadd.f32 %v520_v3, %v514_v24  ;;  %v518_v32 = vld [vmem:[%s3058_s24 + $0x78] sm:$0xff]  ;;  %546 = vst.msk [vmem:[#allocation2] sm:$0xff] %vm545_vm0, %v537_v19  ;;  %v540_v33 = vpack.c.bf16 %v528_v21, %v527_v16  ;;  %v533_v34 = vadd.f32 %v519_v2, %v515_v25  ;;  %v534_v35 = vadd.f32 %v520_v3, %v516_v30 }
  0x2b   : > { %547 = vst.msk [vmem:[#allocation2 + $0x8] sm:$0xff] %vm545_vm0, %v538_v20  ;;  %v535_v36 = vadd.f32 %v519_v2, %v517_v31  ;;  %548 = vst.msk [vmem:[#allocation2 + $0x10] sm:$0xff] %vm545_vm0, %v539_v26  ;;  %v541_v38 = vpack.c.bf16 %v530_v27, %v529_v22  ;;  %v536_v40 = vadd.f32 %v520_v3, %v518_v32 }
  0x2c   : > { %v542_v39 = vpack.c.bf16 %v532_v29, %v531_v28  ;;  %568 = vst [vmem:[%s3094_s20 + $0x38] sm:$0xff] %v2321_v37  ;;  %569 = vst [vmem:[%s3094_s20 + $0x40] sm:$0xff] %v2321_v37  ;;  %v543_v41 = vpack.c.bf16 %v534_v35, %v533_v34 }
  0x2d   : > { %570 = vst [vmem:[%s3094_s20 + $0x48] sm:$0xff] %v2321_v37  ;;  %571 = vst [vmem:[%s3094_s20 + $0x50] sm:$0xff] %v2321_v37  ;;  %v544_v42 = vpack.c.bf16 %v536_v40, %v535_v36 }
  0x2e   : > { %572 = vst [vmem:[%s3094_s20 + $0x58] sm:$0xff] %v2321_v37  ;;  %573 = vst [vmem:[%s3094_s20 + $0x60] sm:$0xff] %v2321_v37 }
  0x2f   : > { %574 = vst [vmem:[%s3094_s20 + $0x68] sm:$0xff] %v2321_v37  ;;  %575 = vst [vmem:[%s3094_s20 + $0x70] sm:$0xff] %v2321_v37 }
  0x30   : > { %576 = vst [vmem:[%s3094_s20 + $0x78] sm:$0xff] %v2321_v37  ;;  %549 = vst.msk [vmem:[#allocation2 + $0x18] sm:$0xff] %vm545_vm0, %v540_v33 }
  0x31   : > { %550 = vst.msk [vmem:[#allocation2 + $0x20] sm:$0xff] %vm545_vm0, %v541_v38  ;;  %551 = vst.msk [vmem:[#allocation2 + $0x28] sm:$0xff] %vm545_vm0, %v542_v39 }
  0x32   : > { %552 = vst.msk [vmem:[#allocation2 + $0x30] sm:$0xff] %vm545_vm0, %v543_v41  ;;  %553 = vst.msk [vmem:[#allocation2 + $0x38] sm:$0xff] %vm545_vm0, %v544_v42 }
  0x33 PF: > { %v2745_v43 = vld [vmem:[%s3064_s30] sm:$0xff]   ;;  %v2746_v44 = vld [vmem:[%s3064_s30 + $0x8] sm:$0xff]   ;;  %vm624_vm1 = vcmask 523264   ;;  %v2747_v45 = vld [vmem:[%s3064_s30 + $0x10] sm:$0xff]   ;;  %v2918_v63 = vmov 0.0   ;;  %vm2919_vm2 = vmmov 0   ;;  %s3692_s24 = scalar_lea.vmem %s3655_s3, %s3053_s21 }
  0x34   : > { %2662 = vmatprep.subr.bf16.mxu1 %v2745_v43  ;;  %2476 = vmatprep.subr.bf16.mxu0 %v2745_v43  ;;  %v2748_v47 = vld [vmem:[%s3064_s30 + $0x18] sm:$0xff]   ;;  %v2749_v49 = vld [vmem:[%s3073_s10] sm:$0xff]   ;;  %v2750_v51 = vld [vmem:[%s3073_s10 + $0x8] sm:$0xff]   ;;  %vm1042_vm3 = vcmask 130048   ;;  %s2155_s21 = sshll.u32 %s3094_s20, 4  ;;  %s3694_s29 = sld [smem:[#allocation18_spill]]  ;;  %s3593_s21 = int_to_ptr.vmem [resolvable:$true] %s2155_s21 }
  0x35   : > { %2666 = vmatpush3.bf16.msra.mxu1 %v2745_v43  ;;  %2477 = vmatpush3.bf16.msra.mxu0 %v2745_v43  ;;  %v578_v53 = vld [vmem:[#allocation2 + $0x8] sm:$0xff]  ;;  %v579_v54 = vld [vmem:[#allocation2 + $0x10] sm:$0xff]  ;;  %v2752_v57 = vld [vmem:[%s3073_s10 + $0x18] sm:$0xff]   ;;  %s2822_s25 = scalar_lea.vmem %s3593_s21, 2048  ;;  %s2920_s26 = smov [#allocation3]  }
  0x36   : > { %2663 = vmatprep.subr.bf16.mxu1 %v2746_v44  ;;  %2478 = vmatprep.subr.bf16.mxu0 %v2746_v44  ;;  %v2751_v55 = vld [vmem:[%s3073_s10 + $0x10] sm:$0xff]   ;;  %v2753_v59 = vld [vmem:[%s3082_s0] sm:$0xff]   ;;  %v2754_v60 = vld [vmem:[%s3082_s0 + $0x8] sm:$0xff]   ;;  %p2823_p1 = scmp.ne.s32.totalorder %s3593_s21, %s2822_s25  ;;  %s2826_s12 = sshll.u32 %s2920_s26, 4  ;;  %s2827_s12 = int_to_ptr.vmem [resolvable:$false] %s2826_s12 }
  0x37   : > { %v580_v58 = vld [vmem:[#allocation2 + $0x18] sm:$0xff]  ;;  %v2755_v61 = vld [vmem:[%s3082_s0 + $0x10] sm:$0xff]   ;;  %v2322_v0 = vld [vmem:[%s3692_s24] ss:$0 sm:$0xff]  ;;  %s2828_s16 = scalar_lea.vmem %s2827_s12, 4096  ;;  %p2829_p5 = scmp.lt.s32.totalorder %s3593_s21, %s2827_s12 }
  0x38   : > { %v3149_v46 = vld [vmem:[#allocation2 + $0x20] sm:$0xff]  ;;  %v582_v50 = vld [vmem:[#allocation2 + $0x28] sm:$0xff]  ;;  %v2756_v62 = vld [vmem:[%s3082_s0 + $0x18] sm:$0xff]   ;;  %p2824_p2 = pnand %p2823_p1, %p3027_p3  ;;  %p2830_p6 = scmp.lt.s32.totalorder %s2828_s16, %s2822_s25 }
  0x39   : > { %2492 = vmatprep.mubr.msk.bf16.mxu1 %vm624_vm1, %v3149_v46  ;;  %2667 = vmatpush3.bf16.msra.mxu1 %v2746_v44  ;;  %v583_v52 = vld [vmem:[#allocation2 + $0x30] sm:$0xff]  ;;  %v584_v56 = vld [vmem:[#allocation2 + $0x38] sm:$0xff]  ;;  %v2335_v42 = vld [vmem:[%s483_s22] ss:$0 sm:$0xff] }
  0x3a   : > { %2479 = vmatpush3.bf16.msra.mxu0 %v2746_v44  ;;  %2664 = vmatprep.subr.bf16.mxu1 %v2747_v45  ;;  %v577_v48 = vld [vmem:[#allocation2] sm:$0xff]  ;;  %p2825_p4 = pneg %p2824_p2  ;;  %p2831_p7 = por %p2830_p6, %p2829_p5 }
  0x3b   : > { %2480 = vmatprep.subr.bf16.mxu0 %v2747_v45  ;;  %2484 = vmatprep.mubr.msk.bf16.mxu0 %vm624_vm1, %v577_v48 }
  0x3c   : > { %p2832_p8 = pnand %p2831_p7, %p2825_p4 }
  0x3d   : > { %2668 = vmatpush3.bf16.msra.mxu1 %v2747_v45 }
  0x3e   : > { %2481 = vmatpush3.bf16.msra.mxu0 %v2747_v45  ;;  %2665 = vmatprep.subr.bf16.mxu1 %v2748_v47 }
  0x3f   : > { %2482 = vmatprep.subr.bf16.mxu0 %v2748_v47 }
  0x41   : > { %2669 = vmatpush3.bf16.msra.mxu1 %v2748_v47 }
  0x42   : > { %2483 = vmatpush3.bf16.msra.mxu0 %v2748_v47  ;;  %2500 = vmatprep.subr.bf16.mxu1 %v2749_v49 }
  0x43   : > { %2524 = vmatprep.subr.bf16.mxu0 %v2753_v59 }
  0x44   : > { %2493 = vmatmul.mubr.msk.bf16.vlgmr.msra.gmra.mrb[0].mxu1 %vm624_vm1, %v582_v50 }
  0x45   : > { %2485 = vmatmul.mubr.msk.bf16.vlgmr.msra.gmra.mrb[0].mxu0 %vm624_vm1, %v578_v53  ;;  %2501 = vmatpush3.bf16.msra.mxu1 %v2749_v49 }
  0x46   : > { %2496 = vmatprep.mubr.msk.bf16.mxu1 %vm624_vm1, %v583_v52  ;;  %2502 = vmatprep.subr.bf16.mxu1 %v2750_v51 }
  0x47   : > { %2488 = vmatprep.mubr.msk.bf16.mxu0 %vm624_vm1, %v579_v54  ;;  %2525 = vmatpush3.bf16.msra.mxu0 %v2753_v59 }
  0x48   : > { %2526 = vmatprep.subr.bf16.mxu0 %v2754_v60 }
  0x49   : > { %2503 = vmatpush3.bf16.msra.mxu1 %v2750_v51 }
  0x4a   : > { %2504 = vmatprep.subr.bf16.mxu1 %v2751_v55 }
  0x4b   : > { %2527 = vmatpush3.bf16.msra.mxu0 %v2754_v60 }
  0x4c   : > { %2497 = vmatmul.mubr.msk.bf16.gmra.mrb[4].mxu1 %vm624_vm1, %v584_v56  ;;  %2528 = vmatprep.subr.bf16.mxu0 %v2755_v61 }
  0x4d   : > { %2489 = vmatmul.mubr.msk.bf16.gmra.mrb[4].mxu0 %vm624_vm1, %v580_v58  ;;  %2505 = vmatpush3.bf16.msra.mxu1 %v2751_v55 }
  0x4e   : > { %2508 = vmatprep.mubr.msk.bf16.mxu1 %vm624_vm1, %v577_v48  ;;  %2506 = vmatprep.subr.bf16.mxu1 %v2752_v57 }
  0x4f   : > { %2532 = vmatprep.mubr.msk.bf16.mxu0 %vm624_vm1, %v577_v48  ;;  %2529 = vmatpush3.bf16.msra.mxu0 %v2755_v61 }
  0x50   : > { %2530 = vmatprep.subr.bf16.mxu0 %v2756_v62 }
  0x51   : > { %2507 = vmatpush3.bf16.msra.mxu1 %v2752_v57 }
  0x52   : > { %2548 = vmatprep.subr.bf16.mxu1 %v2918_v63 }
  0x53   : > { %2531 = vmatpush3.bf16.msra.mxu0 %v2756_v62 }
  0x54   : > { %2509 = vmatmul.mubr.msk.bf16.vlgmr.msra.gmra.mrb[8].mxu1 %vm624_vm1, %v578_v53  ;;  %2572 = vmatprep.subr.bf16.mxu0 %v2918_v63 }
  0x55   : > { %2512 = vmatprep.mubr.msk.bf16.mxu1 %vm624_vm1, %v579_v54 }
  0x56   : > { %2533 = vmatmul.mubr.msk.bf16.vlgmr.msra.gmra.mrb[8].mxu0 %vm624_vm1, %v578_v53 }
  0x57   : > { %2536 = vmatprep.mubr.msk.bf16.mxu0 %vm624_vm1, %v579_v54 }
  0x5c   : > { %2513 = vmatmul.mubr.msk.bf16.gmra.mrb[12].mxu1 %vm624_vm1, %v580_v58 }
  0x5d   : > { %2516 = vmatprep.mubr.msk.bf16.mxu1 %vm624_vm1, %v3149_v46 }
  0x5e   : > { %2537 = vmatmul.mubr.msk.bf16.gmra.mrb[12].mxu0 %vm624_vm1, %v580_v58 }
  0x5f   : > { %2540 = vmatprep.mubr.msk.bf16.mxu0 %vm624_vm1, %v3149_v46 }
  0x64   : > { %2517 = vmatmul.mubr.msk.bf16.gmra.mrb[16].mxu1 %vm624_vm1, %v582_v50 }
  0x65   : > { %2520 = vmatprep.mubr.msk.bf16.mxu1 %vm624_vm1, %v583_v52 }
  0x66   : > { %2541 = vmatmul.mubr.msk.bf16.gmra.mrb[16].mxu0 %vm624_vm1, %v582_v50 }
  0x67   : > { %2544 = vmatprep.mubr.msk.bf16.mxu0 %vm624_vm1, %v583_v52 }
  0x6c   : > { %2521 = vmatmul.mubr.msk.bf16.gmra.mrb[20].mxu1 %vm624_vm1, %v584_v56 }
  0x6d   : > { %2550 = vmatprep.mubr.msk.bf16.mxu1 %vm2919_vm2, %v2918_v63 }
  0x6e   : > { %2545 = vmatmul.mubr.msk.bf16.gmra.mrb[20].mxu0 %vm624_vm1, %v584_v56 }
  0x6f   : > { %2574 = vmatprep.mubr.msk.bf16.mxu0 %vm2919_vm2, %v2918_v63 }
 0x117   : > { %v2494_v1 = vpop.f32.mrb[0].mxu1 }
 0x118   : > { %v2486_v2 = vpop.f32.mrb[0].mxu0  ;;  %v715_v3 = vpop.f32.mrb[1].mxu1  ;;  %v3200_v9 = vadd.f32 %v2494_v1, %v2322_v0 }
 0x119   : > { %v3198_v4 = vadd.f32 %v2486_v2, %v2322_v0  ;;  %v683_v5 = vpop.f32.mrb[1].mxu0  ;;  %v2495_v6 = vpop.f32.mrb[2].mxu1  ;;  %v3206_v14 = vadd.f32 %v2322_v0, %v715_v3 }
 0x11a   : > { %v684_v7 = vadd.f32 %v2322_v0, %v683_v5  ;;  %v2487_v8 = vpop.f32.mrb[2].mxu0  ;;  %v3202_v10 = vadd.f32 %v2495_v6, %v2322_v0  ;;  %v718_v11 = vpop.f32.mrb[3].mxu1 }
 0x11b   : > { %v3204_v12 = vadd.f32 %v2487_v8, %v2322_v0  ;;  %v686_v13 = vpop.f32.mrb[3].mxu0  ;;  %v3208_v15 = vadd.f32 %v2322_v0, %v718_v11 }
 0x11c   : > { %v687_v16 = vadd.f32 %v2322_v0, %v686_v13  ;;  %v1023_v17 = vpack.c.bf16 %v3202_v10, %v3200_v9  ;;  %v2348_v9 = vld [vmem:[%s491_s2] ss:$0 sm:$0xff]  ;;  %s2398_s2 = sshll.u32 %s2904_s17, 11  ;;  %s3695_s17 = sand.u32 1, %s2892_s14  }
 0x11d   : > { %v1019_v18 = vpack.c.bf16 %v3204_v12, %v3198_v4  ;;  %v1022_v19 = vpack.c.bf16 %v3208_v15, %v3206_v14  ;;  %s3600_s23 = scalar_lea.sflag [#allocation4], %s3695_s17 }
 0x11e   : > { %v1018_v20 = vpack.c.bf16 %v687_v16, %v684_v7 }
 0x11f   : > { %v2498_v21 = vpop.f32.mrb[4].mxu1 }
 0x120   : > { %v2490_v22 = vpop.f32.mrb[4].mxu0  ;;  %v731_v23 = vpop.f32.mrb[5].mxu1  ;;  %v3220_v29 = vadd.f32 %v2498_v21, %v2322_v0 }
 0x121   : > { %v3216_v24 = vadd.f32 %v2490_v22, %v2322_v0  ;;  %v699_v25 = vpop.f32.mrb[5].mxu0  ;;  %v2499_v26 = vpop.f32.mrb[6].mxu1  ;;  %v3226_v34 = vadd.f32 %v2322_v0, %v731_v23 }
 0x122   : > { %v3218_v27 = vadd.f32 %v2322_v0, %v699_v25  ;;  %v2491_v28 = vpop.f32.mrb[6].mxu0  ;;  %v3222_v30 = vadd.f32 %v2499_v26, %v2322_v0  ;;  %v734_v31 = vpop.f32.mrb[7].mxu1 }
 0x123   : > { %v3224_v32 = vadd.f32 %v2491_v28, %v2322_v0  ;;  %v702_v33 = vpop.f32.mrb[7].mxu0  ;;  %v3228_v35 = vadd.f32 %v2322_v0, %v734_v31 }
 0x124   : > { %v3230_v36 = vadd.f32 %v2322_v0, %v702_v33  ;;  %v1025_v37 = vpack.c.bf16 %v3222_v30, %v3220_v29 }
 0x125   : > { %v1021_v38 = vpack.c.bf16 %v3224_v32, %v3216_v24  ;;  %v1024_v39 = vpack.c.bf16 %v3228_v35, %v3226_v34 }
 0x126   : > { %v1020_v40 = vpack.c.bf16 %v3230_v36, %v3218_v27 }
 0x127   : > { %v2510_v41 = vpop.f32.mrb[8].mxu1 }
 0x128   : > { %v819_v43 = vpop.f32.mrb[9].mxu1  ;;  %v828_v45 = vadd.f32 %v2510_v41, %v2335_v42 }
 0x129   : > { %v2511_v44 = vpop.f32.mrb[10].mxu1  ;;  %v820_v48 = vadd.f32 %v2335_v42, %v819_v43 }
 0x12a   : > { %v831_v46 = vadd.f32 %v2511_v44, %v2335_v42  ;;  %v822_v47 = vpop.f32.mrb[11].mxu1 }
 0x12b   : > { %v823_v49 = vadd.f32 %v2335_v42, %v822_v47 }
 0x12c   : > { %v1027_v50 = vpack.c.bf16 %v831_v46, %v828_v45 }
 0x12d   : > { %v1026_v51 = vpack.c.bf16 %v823_v49, %v820_v48 }
 0x12e   : > { %v1094_v1 = vsel %vm1042_vm3, %v1027_v50, 0 }
 0x12f   : > { %v1047_v52 = vsel %vm1042_vm3, %v1026_v51, 0  ;;  %v2514_v53 = vpop.f32.mrb[12].mxu1 }
 0x130   : > { %2549 = vmatpush3.bf16.xpose.msra.mxu1 %v1047_v52  ;;  %v844_v54 = vadd.f32 %v2514_v53, %v2335_v42  ;;  %v835_v55 = vpop.f32.mrb[13].mxu1 }
 0x131   : > { %v836_v56 = vadd.f32 %v2335_v42, %v835_v55  ;;  %v2515_v57 = vpop.f32.mrb[14].mxu1  ;;  %2554 = vmatprep.subr.bf16.mxu1 %v2918_v63 }
 0x132   : > { %v847_v58 = vadd.f32 %v2515_v57, %v2335_v42  ;;  %v838_v59 = vpop.f32.mrb[15].mxu1 }
 0x133   : > { %v839_v60 = vadd.f32 %v2335_v42, %v838_v59 }
 0x134   : > { %v1029_v61 = vpack.c.bf16 %v847_v58, %v844_v54 }
 0x135   : > { %v1028_v62 = vpack.c.bf16 %v839_v60, %v836_v56 }
 0x136   : > { %v1188_v33 = vsel %vm1042_vm3, %v1029_v61, 0 }
 0x137   : > { %v2518_v0 = vpop.f32.mrb[16].mxu1  ;;  %2551 = vmatmul.mubr.msk.bf16.vlgmr.msra.gmra.mrb[24].mxu1 %vm1042_vm3, %v1018_v20  ;;  %v1141_v20 = vsel %vm1042_vm3, %v1028_v62, 0 }
 0x138   : > { %v860_v2 = vadd.f32 %v2518_v0, %v2335_v42  ;;  %v851_v3 = vpop.f32.mrb[17].mxu1  ;;  %2555 = vmatpush3.bf16.xpose.msra.mxu1 %v1094_v1  ;;  %2556 = vmatprep.mubr.msk.bf16.mxu1 %vm2919_vm2, %v2918_v63 }
 0x139   : > { %v852_v5 = vadd.f32 %v2335_v42, %v851_v3  ;;  %v2519_v6 = vpop.f32.mrb[18].mxu1  ;;  %2560 = vmatprep.subr.bf16.mxu1 %v2918_v63 }
 0x13a   : > { %v863_v7 = vadd.f32 %v2519_v6, %v2335_v42  ;;  %v854_v8 = vpop.f32.mrb[19].mxu1 }
 0x13b   : > { %v855_v11 = vadd.f32 %v2335_v42, %v854_v8 }
 0x13c   : > { %v1031_v13 = vpack.c.bf16 %v863_v7, %v860_v2 }
 0x13d   : > { %v1030_v16 = vpack.c.bf16 %v855_v11, %v852_v5 }
 0x13e   : > { %v1282_v14 = vsel %vm1042_vm3, %v1031_v13, 0 }
 0x13f   : > { %v2522_v21 = vpop.f32.mrb[20].mxu1  ;;  %2557 = vmatmul.mubr.msk.bf16.vlgmr.msra.gmra.mrb[28].mxu1 %vm1042_vm3, %v1019_v18  ;;  %v1235_v22 = vsel %vm1042_vm3, %v1030_v16, 0 }
 0x140   : > { %v876_v23 = vadd.f32 %v2522_v21, %v2335_v42  ;;  %v867_v25 = vpop.f32.mrb[21].mxu1  ;;  %2561 = vmatpush3.bf16.xpose.msra.mxu1 %v1141_v20  ;;  %2573 = vmatpush3.bf16.xpose.msra.mxu0 %v1235_v22 }
 0x141   : > { %v868_v26 = vadd.f32 %v2335_v42, %v867_v25  ;;  %v2523_v27 = vpop.f32.mrb[22].mxu1  ;;  %2562 = vmatprep.mubr.msk.bf16.mxu1 %vm2919_vm2, %v2918_v63  ;;  %2566 = vmatprep.subr.bf16.mxu1 %v2918_v63 }
 0x142   : > { %v879_v28 = vadd.f32 %v2523_v27, %v2335_v42  ;;  %v870_v31 = vpop.f32.mrb[23].mxu1  ;;  %2584 = vmatprep.subr.bf16.mxu0 %v2918_v63 }
 0x143   : > { %v871_v4 = vadd.f32 %v2335_v42, %v870_v31 }
 0x144   : > { %v1033_v12 = vpack.c.bf16 %v879_v28, %v876_v23 }
 0x145   : > { %v1032_v18 = vpack.c.bf16 %v871_v4, %v868_v26 }
 0x146   : > { %v1376_v15 = vsel %vm1042_vm3, %v1033_v12, 0 }
 0x147   : > { %2563 = vmatmul.mubr.msk.bf16.vlgmr.msra.gmra.mrb[32].mxu1 %vm1042_vm3, %v1020_v40  ;;  %2575 = vmatmul.mubr.msk.bf16.vlgmr.msra.gmra.mrb[24].mxu0 %vm1042_vm3, %v1022_v19  ;;  %v1329_v36 = vsel %vm1042_vm3, %v1032_v18, 0  ;;  %v2534_v19 = vpop.f32.mrb[8].mxu0 }
 0x148   : > { %2567 = vmatpush3.bf16.xpose.msra.mxu1 %v1188_v33  ;;  %2585 = vmatpush3.bf16.xpose.msra.mxu0 %v1329_v36  ;;  %v955_v10 = vpop.f32.mrb[9].mxu0 }
 0x149   : > { %2568 = vmatprep.mubr.msk.bf16.mxu1 %vm2919_vm2, %v2918_v63  ;;  %2586 = vmatprep.mubr.msk.bf16.mxu0 %vm2919_vm2, %v2918_v63  ;;  %v2535_v24 = vpop.f32.mrb[10].mxu0  ;;  %v956_v34 = vadd.f32 %v2348_v9, %v955_v10 }
 0x14a   : > { %2578 = vmatprep.subr.bf16.mxu1 %v2918_v63  ;;  %2596 = vmatprep.subr.bf16.mxu0 %v2918_v63  ;;  %v958_v32 = vpop.f32.mrb[11].mxu0  ;;  %v967_v35 = vadd.f32 %v2535_v24, %v2348_v9 }
 0x14b   : > { %v2538_v30 = vpop.f32.mrb[12].mxu0 }
 0x14c   : > { %v971_v40 = vpop.f32.mrb[13].mxu0 }
 0x14d   : > { %v3312_v41 = vadd.f32 %v2348_v9, %v971_v40  ;;  %v2539_v42 = vpop.f32.mrb[14].mxu0 }
 0x14e   : > { %v3314_v43 = vadd.f32 %v2539_v42, %v2348_v9  ;;  %v974_v44 = vpop.f32.mrb[15].mxu0 }
 0x14f   : > { %2569 = vmatmul.mubr.msk.bf16.vlgmr.msra.gmra.mrb[36].mxu1 %vm1042_vm3, %v1021_v38  ;;  %2587 = vmatmul.mubr.msk.bf16.vlgmr.msra.gmra.mrb[28].mxu0 %vm1042_vm3, %v1024_v39  ;;  %v959_v38 = vadd.f32 %v2348_v9, %v958_v32  ;;  %v3316_v45 = vadd.f32 %v2348_v9, %v974_v44  ;;  %v2542_v47 = vpop.f32.mrb[16].mxu0 }
 0x150   : > { %2579 = vmatpush3.bf16.xpose.msra.mxu1 %v1282_v14  ;;  %2580 = vmatprep.mubr.msk.bf16.mxu1 %vm2919_vm2, %v2918_v63  ;;  %v3322_v49 = vadd.f32 %v2542_v47, %v2348_v9  ;;  %v987_v50 = vpop.f32.mrb[17].mxu0 }
 0x151   : > { %2590 = vmatprep.subr.bf16.mxu1 %v2918_v63  ;;  %2598 = vmatprep.mubr.msk.bf16.mxu0 %vm2919_vm2, %v2918_v63  ;;  %v1034_v29 = vpack.c.bf16 %v959_v38, %v956_v34  ;;  %v1036_v48 = vpack.c.bf16 %v3316_v45, %v3312_v41  ;;  %v3324_v51 = vadd.f32 %v2348_v9, %v987_v50  ;;  %v2543_v52 = vpop.f32.mrb[18].mxu0 }
 0x152   : > { %v3326_v53 = vadd.f32 %v2543_v52, %v2348_v9  ;;  %v990_v54 = vpop.f32.mrb[19].mxu0 }
 0x153   : > { %2597 = vmatpush3.bf16.msra.mxu0 %v1034_v29  ;;  %v3328_v55 = vadd.f32 %v2348_v9, %v990_v54  ;;  %v2546_v56 = vpop.f32.mrb[20].mxu0 }
 0x154   : > { %2608 = vmatprep.subr.bf16.mxu0 %v2918_v63  ;;  %v1039_v57 = vpack.c.bf16 %v3326_v53, %v3322_v49  ;;  %v3332_v58 = vadd.f32 %v2546_v56, %v2348_v9  ;;  %v1003_v59 = vpop.f32.mrb[21].mxu0 }
 0x155   : > { %v1038_v60 = vpack.c.bf16 %v3328_v55, %v3324_v51  ;;  %v3336_v61 = vadd.f32 %v2348_v9, %v1003_v59  ;;  %v2547_v62 = vpop.f32.mrb[22].mxu0 }
 0x156   : > { %v3338_v0 = vadd.f32 %v2547_v62, %v2348_v9  ;;  %v1006_v1 = vpop.f32.mrb[23].mxu0 }
 0x157   : > { %2581 = vmatmul.mubr.msk.bf16.vlgmr.msra.gmra.mrb[40].mxu1 %vm1042_vm3, %v1023_v17  ;;  %v964_v17 = vadd.f32 %v2534_v19, %v2348_v9  ;;  %v3340_v2 = vadd.f32 %v2348_v9, %v1006_v1 }
 0x158   : > { %2591 = vmatpush3.bf16.xpose.msra.mxu1 %v1376_v15  ;;  %2592 = vmatprep.mubr.msk.bf16.mxu1 %vm2919_vm2, %v2918_v63  ;;  %v1041_v3 = vpack.c.bf16 %v3338_v0, %v3332_v58 }
 0x159   : > { %2602 = vmatprep.subr.bf16.mxu1 %v2918_v63  ;;  %v1035_v39 = vpack.c.bf16 %v967_v35, %v964_v17  ;;  %v1040_v5 = vpack.c.bf16 %v3340_v2, %v3336_v61 }
 0x15f   : > { %2593 = vmatmul.mubr.msk.bf16.vlgmr.msra.gmra.mrb[44].mxu1 %vm1042_vm3, %v1025_v37  ;;  %v3308_v37 = vadd.f32 %v2538_v30, %v2348_v9 }
 0x160   : > { %2604 = vmatprep.mubr.msk.bf16.mxu1 %vm2919_vm2, %v2918_v63  ;;  %2603 = vmatpush3.bf16.msra.mxu1 %v1035_v39 }
 0x161   : > { %2614 = vmatprep.subr.bf16.mxu1 %v2918_v63  ;;  %v1037_v46 = vpack.c.bf16 %v3314_v43, %v3308_v37 }
 0x20a   : > { %v3346_v6 = vpop.f32.mrb[24].mxu1 }
 0x20b   : > { %v1419_v7 = vsel %vm1042_vm3, %v3346_v6, -inf  ;;  %v2552_v8 = vpop.f32.mrb[25].mxu1 }
 0x20c   : > { %1420 = vmax.xlane.f32.xlu0 %v1419_v7  ;;  %v3350_v11 = vpop.f32.mrb[26].mxu1 }
 0x20d   : > { %v2553_v13 = vpop.f32.mrb[27].mxu1  ;;  %v1422_v16 = vsel %vm1042_vm3, %v3350_v11, -inf }
 0x210   : > { %1423 = vmax.xlane.f32.xlu0 %v1422_v16 }
 0x212   : > { %v3354_v21 = vpop.f32.mrb[28].mxu1 }
 0x213   : > { %v1425_v20 = vsel %vm1042_vm3, %v3354_v21, -inf  ;;  %v2558_v22 = vpop.f32.mrb[29].mxu1 }
 0x214   : > { %1426 = vmax.xlane.f32.xlu1 %v1425_v20  ;;  %v3358_v23 = vpop.f32.mrb[30].mxu1 }
 0x215   : > { %v2559_v25 = vpop.f32.mrb[31].mxu1  ;;  %v1428_v26 = vsel %vm1042_vm3, %v3358_v23, -inf }
 0x218   : > { %1429 = vmax.xlane.f32.xlu1 %v1428_v26 }
 0x21a   : > { %v3362_v27 = vpop.f32.mrb[32].mxu1  ;;  %v3364_v28 = vpop.f32.mrb[24].mxu0 }
 0x21b   : > { %v2564_v31 = vpop.f32.mrb[33].mxu1  ;;  %v2576_v4 = vpop.f32.mrb[25].mxu0  ;;  %v1431_v12 = vsel %vm1042_vm3, %v3362_v27, -inf  ;;  %v1443_v29 = vsel %vm1042_vm3, %v3364_v28, -inf }
 0x21c   : > { %v3368_v18 = vpop.f32.mrb[26].mxu0  ;;  %1432 = vmax.xlane.f32.xlu0 %v1431_v12  ;;  %v3370_v33 = vpop.f32.mrb[34].mxu1 }
 0x21d   : > { %v2577_v36 = vpop.f32.mrb[27].mxu0  ;;  %v1434_v14 = vsel %vm1042_vm3, %v3370_v33, -inf  ;;  %v2565_v15 = vpop.f32.mrb[35].mxu1  ;;  %v1446_v30 = vsel %vm1042_vm3, %v3368_v18, -inf }
 0x21e   : > { %1435 = vmax.xlane.f32.xlu1 %v1434_v14 }
 0x222   : > { %v3374_v19 = vpop.f32.mrb[36].mxu1  ;;  %v3376_v9 = vpop.f32.mrb[28].mxu0 }
 0x223   : > { %v2570_v10 = vpop.f32.mrb[37].mxu1  ;;  %v2588_v17 = vpop.f32.mrb[29].mxu0  ;;  %v1437_v24 = vsel %vm1042_vm3, %v3374_v19, -inf  ;;  %v1455_v54 = vsel %vm1042_vm3, %v3376_v9, -inf }
 0x224   : > { %v3380_v32 = vpop.f32.mrb[30].mxu0  ;;  %1438 = vmax.xlane.f32.xlu0 %v1437_v24  ;;  %v3382_v34 = vpop.f32.mrb[38].mxu1 }
 0x225   : > { %v2589_v35 = vpop.f32.mrb[31].mxu0  ;;  %v1440_v38 = vsel %vm1042_vm3, %v3382_v34, -inf  ;;  %v2571_v39 = vpop.f32.mrb[39].mxu1  ;;  %v1458_v56 = vsel %vm1042_vm3, %v3380_v32, -inf }
 0x226   : > { %1441 = vmax.xlane.f32.xlu1 %v1440_v38 }
 0x228   : > { %1444 = vmax.xlane.f32.xlu0 %v1443_v29 }
 0x22a   : > { %1447 = vmax.xlane.f32.xlu1 %v1446_v30  ;;  %v3390_v40 = vpop.f32.mrb[40].mxu1 }
 0x22b   : > { %v2582_v42 = vpop.f32.mrb[41].mxu1  ;;  %v1449_v44 = vsel %vm1042_vm3, %v3390_v40, -inf }
 0x22c   : > { %1450 = vmax.xlane.f32.xlu0 %v1449_v44  ;;  %v3394_v47 = vpop.f32.mrb[42].mxu1 }
 0x22d   : > { %v2583_v50 = vpop.f32.mrb[43].mxu1  ;;  %v1452_v52 = vsel %vm1042_vm3, %v3394_v47, -inf }
 0x22e   : > { %1453 = vmax.xlane.f32.xlu1 %v1452_v52 }
 0x230   : > { %1456 = vmax.xlane.f32.xlu0 %v1455_v54 }
 0x232   : > { %1459 = vmax.xlane.f32.xlu1 %v1458_v56  ;;  %v3402_v59 = vpop.f32.mrb[44].mxu1 }
 0x233   : > { %v2594_v62 = vpop.f32.mrb[45].mxu1  ;;  %v1461_v1 = vsel %vm1042_vm3, %v3402_v59, -inf }
 0x234   : > { %1462 = vmax.xlane.f32.xlu0 %v1461_v1  ;;  %v3406_v7 = vpop.f32.mrb[46].mxu1 }
 0x235   : > { %v2595_v8 = vpop.f32.mrb[47].mxu1  ;;  %v1464_v13 = vsel %vm1042_vm3, %v3406_v7, -inf }
 0x236   : > { %1465 = vmax.xlane.f32.xlu1 %v1464_v13 }
 0x299   : > { %v1421_v16 = vpop.xlane.xlu0 %1420 }
 0x29a   : > { %v1467_v20 = vsub.f32 %v3346_v6, %v1421_v16 }
 0x29c   : > { %v1483_v22 = vmul.f32 1.442695, %v1467_v20 }
 0x29d   : > { %v1424_v25 = vpop.xlane.xlu0 %1423 }
 0x29e   : > { %2758 = vpow2.f32 %v1483_v22  ;;  %v1468_v26 = vsub.f32 %v3350_v11, %v1424_v25 }
 0x2a0   : > { %v1485_v31 = vmul.f32 1.442695, %v1468_v26 }
 0x2a1   : > { %v1427_v4 = vpop.xlane.xlu1 %1426 }
 0x2a2   : > { %2760 = vpow2.f32 %v1485_v31  ;;  %v1469_v12 = vsub.f32 %v3354_v21, %v1427_v4 }
 0x2a4   : > { %v1487_v36 = vmul.f32 1.442695, %v1469_v12 }
 0x2a5   : > { %v1430_v14 = vpop.xlane.xlu1 %1429 }
 0x2a6   : > { %2762 = vpow2.f32 %v1487_v36  ;;  %v1470_v15 = vsub.f32 %v3358_v23, %v1430_v14 }
 0x2a8   : > { %v3414_v10 = vpop.eup %2758  ;;  %v1489_v17 = vmul.f32 1.442695, %v1470_v15 }
 0x2a9   : > { %v1433_v24 = vpop.xlane.xlu0 %1432  ;;  %v1515_v6 = vsel %vm1042_vm3, %v3414_v10, 0.0 }
 0x2aa   : > { %2764 = vpow2.f32 %v1489_v17  ;;  %v1471_v11 = vsub.f32 %v3362_v27, %v1433_v24  ;;  %1516 = vadd.xlane.f32.xlu0 %v1515_v6 }
 0x2ab   : > { %v1436_v35 = vpop.xlane.xlu1 %1435 }
 0x2ac   : > { %v3419_v38 = vpop.eup %2760  ;;  %v1491_v21 = vmul.f32 1.442695, %v1471_v11  ;;  %v1472_v39 = vsub.f32 %v3370_v33, %v1436_v35 }
 0x2ad   : > { %v1518_v23 = vsel %vm1042_vm3, %v3419_v38, 0.0 }
 0x2ae   : > { %2766 = vpow2.f32 %v1491_v21  ;;  %v1493_v29 = vmul.f32 1.442695, %v1472_v39  ;;  %1519 = vadd.xlane.f32.xlu1 %v1518_v23 }
 0x2b0   : > { %v3424_v30 = vpop.eup %2762  ;;  %2768 = vpow2.f32 %v1493_v29 }
 0x2b1   : > { %v1439_v42 = vpop.xlane.xlu0 %1438  ;;  %v1521_v27 = vsel %vm1042_vm3, %v3424_v30, 0.0 }
 0x2b2   : > { %v1473_v44 = vsub.f32 %v3374_v19, %v1439_v42  ;;  %1522 = vadd.xlane.f32.xlu0 %v1521_v27 }
 0x2b3   : > { %v1442_v50 = vpop.xlane.xlu1 %1441 }
 0x2b4   : > { %v3429_v52 = vpop.eup %2764  ;;  %v1495_v33 = vmul.f32 1.442695, %v1473_v44  ;;  %v1474_v54 = vsub.f32 %v3382_v34, %v1442_v50 }
 0x2b5   : > { %v1445_v56 = vpop.xlane.xlu0 %1444  ;;  %v1524_v62 = vsel %vm1042_vm3, %v3429_v52, 0.0 }
 0x2b6   : > { %2770 = vpow2.f32 %v1495_v33  ;;  %v1497_v1 = vmul.f32 1.442695, %v1474_v54  ;;  %v1475_v8 = vsub.f32 %v3364_v28, %v1445_v56  ;;  %1525 = vadd.xlane.f32.xlu1 %v1524_v62 }
 0x2b7   : > { %v1448_v13 = vpop.xlane.xlu1 %1447 }
 0x2b8   : > { %v3435_v16 = vpop.eup %2766  ;;  %2772 = vpow2.f32 %v1497_v1  ;;  %v1499_v19 = vmul.f32 1.442695, %v1475_v8  ;;  %v1476_v20 = vsub.f32 %v3368_v18, %v1448_v13 }
 0x2b9   : > { %v1451_v22 = vpop.xlane.xlu0 %1450  ;;  %v1527_v34 = vsel %vm1042_vm3, %v3435_v16, 0.0 }
 0x2ba   : > { %v3440_v25 = vpop.eup %2768  ;;  %2774 = vpow2.f32 %v1499_v19  ;;  %v1501_v26 = vmul.f32 1.442695, %v1476_v20  ;;  %v1477_v31 = vsub.f32 %v3390_v40, %v1451_v22  ;;  %1528 = vadd.xlane.f32.xlu0 %v1527_v34 }
 0x2bb   : > { %v1454_v28 = vpop.xlane.xlu1 %1453  ;;  %v1530_v4 = vsel %vm1042_vm3, %v3440_v25, 0.0 }
 0x2bc   : > { %2776 = vpow2.f32 %v1501_v26  ;;  %v1503_v12 = vmul.f32 1.442695, %v1477_v31  ;;  %v1478_v36 = vsub.f32 %v3394_v47, %v1454_v28  ;;  %1531 = vadd.xlane.f32.xlu1 %v1530_v4 }
 0x2bd   : > { %v1457_v18 = vpop.xlane.xlu0 %1456 }
 0x2be   : > { %2778 = vpow2.f32 %v1503_v12  ;;  %v1505_v14 = vmul.f32 1.442695, %v1478_v36  ;;  %v1479_v15 = vsub.f32 %v3376_v9, %v1457_v18 }
 0x2bf   : > { %v1460_v17 = vpop.xlane.xlu1 %1459 }
 0x2c0   : > { %v3447_v24 = vpop.eup %2770  ;;  %2780 = vpow2.f32 %v1505_v14  ;;  %v1507_v40 = vmul.f32 1.442695, %v1479_v15  ;;  %v1480_v6 = vsub.f32 %v3380_v32, %v1460_v17 }
 0x2c1   : > { %v1463_v11 = vpop.xlane.xlu0 %1462  ;;  %v1533_v35 = vsel %vm1042_vm3, %v3447_v24, 0.0 }
 0x2c2   : > { %v3452_v21 = vpop.eup %2772  ;;  %2782 = vpow2.f32 %v1507_v40  ;;  %v1509_v47 = vmul.f32 1.442695, %v1480_v6  ;;  %v1481_v39 = vsub.f32 %v3402_v59, %v1463_v11  ;;  %1534 = vadd.xlane.f32.xlu0 %v1533_v35 }
 0x2c3   : > { %v1466_v23 = vpop.xlane.xlu1 %1465  ;;  %v1536_v9 = vsel %vm1042_vm3, %v3452_v21, 0.0 }
 0x2c4   : > { %v3457_v29 = vpop.eup %2774  ;;  %2784 = vpow2.f32 %v1509_v47  ;;  %v1511_v42 = vmul.f32 1.442695, %v1481_v39  ;;  %v1482_v32 = vsub.f32 %v3406_v7, %v1466_v23  ;;  %1537 = vadd.xlane.f32.xlu1 %v1536_v9 }
 0x2c5   : > { %v1539_v27 = vsel %vm1042_vm3, %v3457_v29, 0.0 }
 0x2c6   : > { %v3462_v44 = vpop.eup %2776  ;;  %2786 = vpow2.f32 %v1511_v42  ;;  %v1513_v50 = vmul.f32 1.442695, %v1482_v32  ;;  %1540 = vadd.xlane.f32.xlu0 %v1539_v27 }
 0x2c7   : > { %v1542_v59 = vsel %vm1042_vm3, %v3462_v44, 0.0 }
 0x2c8   : > { %v3466_v33 = vpop.eup %2778  ;;  %2788 = vpow2.f32 %v1513_v50  ;;  %1543 = vadd.xlane.f32.xlu1 %v1542_v59 }
 0x2c9   : > { %v1545_v54 = vsel %vm1042_vm3, %v3466_v33, 0.0 }
 0x2ca   : > { %v3470_v7 = vpop.eup %2780  ;;  %1546 = vadd.xlane.f32.xlu0 %v1545_v54 }
 0x2cb   : > { %v1548_v56 = vsel %vm1042_vm3, %v3470_v7, 0.0 }
 0x2cc   : > { %v3474_v62 = vpop.eup %2782  ;;  %1549 = vadd.xlane.f32.xlu1 %v1548_v56 }
 0x2cd   : > { %v1551_v1 = vsel %vm1042_vm3, %v3474_v62, 0.0 }
 0x2ce   : > { %v3478_v8 = vpop.eup %2784  ;;  %1552 = vadd.xlane.f32.xlu0 %v1551_v1 }
 0x2cf   : > { %v1554_v13 = vsel %vm1042_vm3, %v3478_v8, 0.0 }
 0x2d0   : > { %v3482_v19 = vpop.eup %2786  ;;  %1555 = vadd.xlane.f32.xlu1 %v1554_v13 }
 0x2d1   : > { %v1557_v20 = vsel %vm1042_vm3, %v3482_v19, 0.0 }
 0x2d2   : > { %v3486_v22 = vpop.eup %2788  ;;  %1558 = vadd.xlane.f32.xlu0 %v1557_v20 }
 0x2d3   : > { %v1560_v34 = vsel %vm1042_vm3, %v3486_v22, 0.0 }
 0x2d4   : > { %1561 = vadd.xlane.f32.xlu1 %v1560_v34 }
 0x337   : > { %v1517_v26 = vpop.xlane.xlu0 %1516 }
 0x338   : > { %2790 = vrcp.f32 %v1517_v26 }
 0x33b   : > { %v1520_v31 = vpop.xlane.xlu1 %1519 }
 0x33c   : > { %2792 = vrcp.f32 %v1520_v31 }
 0x33f   : > { %v1523_v28 = vpop.xlane.xlu0 %1522 }
 0x340   : > { %2794 = vrcp.f32 %v1523_v28 }
 0x342   : > { %v2791_v12 = vpop.eup %2790 }
 0x343   : > { %v1526_v4 = vpop.xlane.xlu1 %1525  ;;  %v1579_v18 = vmul.f32 %v2791_v12, %v3414_v10 }
 0x344   : > { %2796 = vrcp.f32 %v1526_v4 }
 0x346   : > { %v2793_v36 = vpop.eup %2792 }
 0x347   : > { %v1580_v14 = vmul.f32 %v2793_v36, %v3419_v38  ;;  %v1529_v15 = vpop.xlane.xlu0 %1528 }
 0x348   : > { %2798 = vrcp.f32 %v1529_v15 }
 0x349   : > { %v1532_v17 = vpop.xlane.xlu1 %1531  ;;  %v1595_v40 = vpack.c.bf16 %v1580_v14, %v1579_v18 }
 0x34a   : > { %2800 = vrcp.f32 %v1532_v17  ;;  %v2795_v6 = vpop.eup %2794 }
 0x34b   : > { %2599 = vmatmul.mubr.msk.bf16.vlgmr.msra.gmra.mrb[32].mxu0 %vm1042_vm3, %v1595_v40  ;;  %v1581_v38 = vmul.f32 %v2795_v6, %v3424_v30 }
 0x34c   : > { %2609 = vmatpush3.bf16.msra.mxu0 %v1036_v48  ;;  %2610 = vmatprep.mubr.msk.bf16.mxu0 %vm2919_vm2, %v2918_v63 }
 0x34d   : > { %2620 = vmatprep.subr.bf16.mxu0 %v2918_v63 }
 0x34e   : > { %v2797_v10 = vpop.eup %2796 }
 0x34f   : > { %v1582_v11 = vmul.f32 %v2797_v10, %v3429_v52  ;;  %v1535_v35 = vpop.xlane.xlu0 %1534 }
 0x350   : > { %2802 = vrcp.f32 %v1535_v35 }
 0x351   : > { %v1538_v47 = vpop.xlane.xlu1 %1537  ;;  %v1596_v39 = vpack.c.bf16 %v1582_v11, %v1581_v38 }
 0x352   : > { %v2799_v23 = vpop.eup %2798  ;;  %2804 = vrcp.f32 %v1538_v47 }
 0x353   : > { %v1541_v9 = vpop.xlane.xlu0 %1540  ;;  %2605 = vmatmul.mubr.msk.bf16.vlgmr.msra.gmra.mrb[48].mxu1 %vm1042_vm3, %v1596_v39  ;;  %v1583_v45 = vmul.f32 %v2799_v23, %v3435_v16 }
 0x354   : > { %v2801_v41 = vpop.eup %2800  ;;  %2806 = vrcp.f32 %v1541_v9  ;;  %2615 = vmatpush3.bf16.msra.mxu1 %v1037_v46  ;;  %2616 = vmatprep.mubr.msk.bf16.mxu1 %vm2919_vm2, %v2918_v63 }
 0x355   : > { %v1584_v48 = vmul.f32 %v2801_v41, %v3440_v25  ;;  %v1544_v30 = vpop.xlane.xlu1 %1543  ;;  %2626 = vmatprep.subr.bf16.mxu1 %v2918_v63 }
 0x356   : > { %2808 = vrcp.f32 %v1544_v30 }
 0x357   : > { %v1547_v52 = vpop.xlane.xlu0 %1546  ;;  %v1597_v42 = vpack.c.bf16 %v1584_v48, %v1583_v45 }
 0x358   : > { %2810 = vrcp.f32 %v1547_v52 }
 0x359   : > { %2611 = vmatmul.mubr.msk.bf16.vlgmr.msra.gmra.mrb[36].mxu0 %vm1042_vm3, %v1597_v42  ;;  %v1550_v32 = vpop.xlane.xlu1 %1549 }
 0x35a   : > { %v2803_v27 = vpop.eup %2802  ;;  %2621 = vmatpush3.bf16.msra.mxu0 %v1038_v60  ;;  %2812 = vrcp.f32 %v1550_v32  ;;  %2622 = vmatprep.mubr.msk.bf16.mxu0 %vm2919_vm2, %v2918_v63 }
 0x35b   : > { %v1553_v37 = vpop.xlane.xlu0 %1552  ;;  %2632 = vmatprep.subr.bf16.mxu0 %v2918_v63  ;;  %v1585_v46 = vmul.f32 %v2803_v27, %v3447_v24 }
 0x35c   : > { %v2805_v43 = vpop.eup %2804  ;;  %2814 = vrcp.f32 %v1553_v37 }
 0x35d   : > { %v1586_v16 = vmul.f32 %v2805_v43, %v3452_v21  ;;  %v1556_v25 = vpop.xlane.xlu1 %1555 }
 0x35e   : > { %v2807_v50 = vpop.eup %2806  ;;  %2816 = vrcp.f32 %v1556_v25 }
 0x35f   : > { %v1559_v59 = vpop.xlane.xlu0 %1558  ;;  %v1598_v54 = vpack.c.bf16 %v1586_v16, %v1585_v46  ;;  %v1587_v55 = vmul.f32 %v2807_v50, %v3457_v29  ;;  %v1957_v50 = vld [vmem:[%s3094_s20 + $0x10] sm:$0xff] }
 0x360   : > { %v2809_v51 = vpop.eup %2808  ;;  %2818 = vrcp.f32 %v1559_v59  ;;  %v1955_v59 = vld [vmem:[%s3094_s20] sm:$0xff] }
 0x361   : > { %v1588_v60 = vmul.f32 %v2809_v51, %v3462_v44  ;;  %2617 = vmatmul.mubr.msk.bf16.vlgmr.msra.gmra.mrb[52].mxu1 %vm1042_vm3, %v1598_v54  ;;  %v1562_v56 = vpop.xlane.xlu1 %1561  ;;  %v1958_v51 = vld [vmem:[%s3094_s20 + $0x18] sm:$0xff] }
 0x362   : > { %v2811_v1 = vpop.eup %2810  ;;  %2627 = vmatpush3.bf16.msra.mxu1 %v1039_v57  ;;  %2820 = vrcp.f32 %v1562_v56  ;;  %2628 = vmatprep.mubr.msk.bf16.mxu1 %vm2919_vm2, %v2918_v63  ;;  %v1956_v56 = vld [vmem:[%s3094_s20 + $0x8] sm:$0xff] }
 0x363   : > { %v1599_v24 = vpack.c.bf16 %v1588_v60, %v1587_v55  ;;  %2638 = vmatprep.subr.bf16.mxu1 %v2918_v63  ;;  %v1589_v29 = vmul.f32 %v2811_v1, %v3466_v33 }
 0x364   : > { %v2813_v21 = vpop.eup %2812 }
 0x365   : > { %v1590_v44 = vmul.f32 %v2813_v21, %v3470_v7  ;;  %2623 = vmatmul.mubr.msk.bf16.vlgmr.msra.gmra.mrb[40].mxu0 %vm1042_vm3, %v1599_v24 }
 0x366   : > { %v2815_v13 = vpop.eup %2814  ;;  %2633 = vmatpush3.bf16.msra.mxu0 %v1040_v5  ;;  %2634 = vmatprep.mubr.msk.bf16.mxu0 %vm2919_vm2, %v2918_v63 }
 0x367   : > { %v1600_v49 = vpack.c.bf16 %v1590_v44, %v1589_v29  ;;  %v1591_v57 = vmul.f32 %v2815_v13, %v3474_v62  ;;  %v1961_v13 = vld [vmem:[%s3094_s20 + $0x30] sm:$0xff] }
 0x368   : > { %v2817_v53 = vpop.eup %2816 }
 0x369   : > { %v1592_v20 = vmul.f32 %v2817_v53, %v3478_v8  ;;  %2629 = vmatmul.mubr.msk.bf16.vlgmr.msra.gmra.mrb[56].mxu1 %vm1042_vm3, %v1600_v49  ;;  %v2757_v8 = vld [vmem:[%s3092_s13] sm:$0xff]   ;;  %s3591_s13 = scalar_lea.hbm %s3694_s29, %s2398_s2 }
 0x36a   : > { %v2819_v33 = vpop.eup %2818  ;;  %2639 = vmatpush3.bf16.msra.mxu1 %v1041_v3  ;;  %2640 = vmatprep.mubr.msk.bf16.mxu1 %vm2919_vm2, %v2918_v63  ;;  %v1959_v49 = vld [vmem:[%s3094_s20 + $0x20] sm:$0xff] }
 0x36b   : > { %v1601_v61 = vpack.c.bf16 %v1592_v20, %v1591_v57  ;;  %v1593_v5 = vmul.f32 %v2819_v33, %v3482_v19  ;;  %2644 = vmatprep.subr.bf16.mxu0 %v2757_v8  ;;  %v1962_v57 = vld [vmem:[%s3094_s20 + $0x38] sm:$0xff] }
 0x36c   : > { %v2821_v2 = vpop.eup %2820 }
 0x36d   : > { %v1594_v7 = vmul.f32 %v2821_v2, %v3486_v22  ;;  %2635 = vmatmul.mubr.msk.bf16.vlgmr.msra.gmra.mrb[44].mxu0 %vm1042_vm3, %v1601_v61  ;;  %v1960_v61 = vld [vmem:[%s3094_s20 + $0x28] sm:$0xff] }
 0x36e   : > { %2645 = vmatpush3.bf16.msra.mxu0 %v2757_v8 }
 0x36f   : > { %v1602_v62 = vpack.c.bf16 %v1594_v7, %v1593_v5 }
 0x371   : > { %2641 = vmatmul.mubr.msk.bf16.vlgmr.msra.gmra.mrb[60].mxu1 %vm1042_vm3, %v1602_v62 }
 0x41e   : > { %v1640_v34 = vpop.f32.mrb[32].mxu0 }
 0x41f   : > { %v2600_v58 = vpop.f32.mrb[33].mxu0 }
 0x420   : > { %v1643_v0 = vpop.f32.mrb[34].mxu0  ;;  %v1963_v58 = vld [vmem:[%s3094_s20 + $0x40] sm:$0xff] }
 0x421   : > { %v1971_v3 = vpack.c.bf16 %v1643_v0, %v1640_v34  ;;  %v2601_v26 = vpop.f32.mrb[35].mxu0  ;;  %v1965_v34 = vld [vmem:[%s3094_s20 + $0x50] sm:$0xff] }
 0x423   : > { %2646 = vmatprep.mubr.msk.bf16.mxu0 %vm1042_vm3, %v1971_v3  ;;  %v1966_v3 = vld [vmem:[%s3094_s20 + $0x58] sm:$0xff] }
 0x426   : > { %v1684_v63 = vpop.f32.mrb[48].mxu1 }
 0x427   : > { %v2606_v31 = vpop.f32.mrb[49].mxu1 }
 0x428   : > { %v1687_v19 = vpop.f32.mrb[50].mxu1  ;;  %v1964_v31 = vld [vmem:[%s3094_s20 + $0x48] sm:$0xff] }
 0x429   : > { %v1972_v28 = vpack.c.bf16 %v1687_v19, %v1684_v63  ;;  %v2607_v22 = vpop.f32.mrb[51].mxu1 }
 0x42b   : > { %2647 = vmatmul.mubr.msk.bf16.vlgmr.msra.gmra.mrb[48].mxu0 %vm1042_vm3, %v1972_v28 }
 0x42c   : > { %v1728_v4 = vpop.f32.mrb[36].mxu0 }
 0x42d   : > { %v2612_v12 = vpop.f32.mrb[37].mxu0 }
 0x42e   : > { %v1731_v36 = vpop.f32.mrb[38].mxu0 }
 0x42f   : > { %v1973_v18 = vpack.c.bf16 %v1731_v36, %v1728_v4  ;;  %v2613_v14 = vpop.f32.mrb[39].mxu0  ;;  %v1969_v36 = vld [vmem:[%s3094_s20 + $0x70] sm:$0xff] }
 0x431   : > { %2650 = vmatprep.mubr.msk.bf16.mxu0 %vm1042_vm3, %v1973_v18  ;;  %v1967_v18 = vld [vmem:[%s3094_s20 + $0x60] sm:$0xff] }
 0x434   : > { %v1772_v15 = vpop.f32.mrb[52].mxu1 }
 0x435   : > { %v2618_v17 = vpop.f32.mrb[53].mxu1 }
 0x436   : > { %v1775_v40 = vpop.f32.mrb[54].mxu1 }
 0x437   : > { %v1974_v6 = vpack.c.bf16 %v1775_v40, %v1772_v15  ;;  %v2619_v10 = vpop.f32.mrb[55].mxu1  ;;  %v1970_v15 = vld [vmem:[%s3094_s20 + $0x78] sm:$0xff] }
 0x438   : > { %v1816_v38 = vpop.f32.mrb[40].mxu0 }
 0x439   : > { %v2624_v11 = vpop.f32.mrb[41].mxu0  ;;  %2651 = vmatmul.mubr.msk.bf16.gmra.mrb[52].mxu0 %vm1042_vm3, %v1974_v6  ;;  %v1968_v6 = vld [vmem:[%s3094_s20 + $0x68] sm:$0xff] }
 0x43a   : > { %v1819_v35 = vpop.f32.mrb[42].mxu0 }
 0x43b   : > { %v1975_v47 = vpack.c.bf16 %v1819_v35, %v1816_v38  ;;  %v2625_v39 = vpop.f32.mrb[43].mxu0 }
 0x43c   : > { %v1860_v23 = vpop.f32.mrb[56].mxu1 }
 0x43d   : > { %v2630_v9 = vpop.f32.mrb[57].mxu1  ;;  %2654 = vmatprep.mubr.msk.bf16.mxu0 %vm1042_vm3, %v1975_v47 }
 0x43e   : > { %v1863_v41 = vpop.f32.mrb[58].mxu1 }
 0x43f   : > { %v1976_v45 = vpack.c.bf16 %v1863_v41, %v1860_v23  ;;  %v2631_v48 = vpop.f32.mrb[59].mxu1 }
 0x440   : > { %v1904_v30 = vpop.f32.mrb[44].mxu0 }
 0x441   : > { %v2636_v52 = vpop.f32.mrb[45].mxu0  ;;  %2655 = vmatmul.mubr.msk.bf16.gmra.mrb[56].mxu0 %vm1042_vm3, %v1976_v45 }
 0x442   : > { %v1907_v42 = vpop.f32.mrb[46].mxu0 }
 0x443   : > { %v1977_v32 = vpack.c.bf16 %v1907_v42, %v1904_v30  ;;  %v2637_v27 = vpop.f32.mrb[47].mxu0 }
 0x444   : > { %v1948_v37 = vpop.f32.mrb[60].mxu1 }
 0x445   : > { %v2642_v43 = vpop.f32.mrb[61].mxu1  ;;  %2658 = vmatprep.mubr.msk.bf16.mxu0 %vm1042_vm3, %v1977_v32 }
 0x446   : > { %v1951_v46 = vpop.f32.mrb[62].mxu1 }
 0x447   : > { %v1978_v16 = vpack.c.bf16 %v1951_v46, %v1948_v37  ;;  %v2643_v25 = vpop.f32.mrb[63].mxu1 }
 0x449   : > { %2659 = vmatmul.mubr.msk.bf16.gmra.mrb[60].mxu0 %vm1042_vm3, %v1978_v16 }
 0x4fe   : > { %v2648_v54 = vpop.f32.mrb[48].mxu0 }
 0x4ff   : > { %v2110_v55 = vadd.f32 %v2648_v54, %v1957_v50  ;;  %v2045_v60 = vpop.f32.mrb[49].mxu0 }
 0x500   : > { %v2108_v1 = vadd.f32 %v2045_v60, %v1955_v59  ;;  %v2649_v24 = vpop.f32.mrb[50].mxu0 }
 0x501   : > { %2126 = vst [vmem:[%s3094_s20 + $0x10] sm:$0xff] %v2110_v55  ;;  %v2111_v21 = vadd.f32 %v2649_v24, %v1958_v51  ;;  %v2048_v29 = vpop.f32.mrb[51].mxu0 }
 0x502   : > { %2124 = vst [vmem:[%s3094_s20] sm:$0xff] %v2108_v1  ;;  %v2109_v44 = vadd.f32 %v2048_v29, %v1956_v56 }
 0x503   : > { %2127 = vst [vmem:[%s3094_s20 + $0x18] sm:$0xff] %v2111_v21 }
 0x504   : > { %2125 = vst [vmem:[%s3094_s20 + $0x8] sm:$0xff] %v2109_v44 }
 0x50c   : > { %v2652_v53 = vpop.f32.mrb[52].mxu0 }
 0x50d   : > { %v2114_v20 = vadd.f32 %v2652_v53, %v1961_v13  ;;  %v2061_v33 = vpop.f32.mrb[53].mxu0 }
 0x50e   : > { %v2112_v2 = vadd.f32 %v2061_v33, %v1959_v49  ;;  %v2653_v5 = vpop.f32.mrb[54].mxu0 }
 0x50f   : > { %2130 = vst [vmem:[%s3094_s20 + $0x30] sm:$0xff] %v2114_v20  ;;  %v2115_v7 = vadd.f32 %v2653_v5, %v1962_v57  ;;  %v2064_v62 = vpop.f32.mrb[55].mxu0 }
 0x510   : > { %2128 = vst [vmem:[%s3094_s20 + $0x20] sm:$0xff] %v2112_v2  ;;  %v2113_v8 = vadd.f32 %v2064_v62, %v1960_v61 }
 0x511   : > { %2131 = vst [vmem:[%s3094_s20 + $0x38] sm:$0xff] %v2115_v7 }
 0x512   : > { %2129 = vst [vmem:[%s3094_s20 + $0x28] sm:$0xff] %v2113_v8 }
 0x514   : > { %v2656_v0 = vpop.f32.mrb[56].mxu0 }
 0x515   : > { %v2118_v26 = vadd.f32 %v2656_v0, %v1965_v34  ;;  %v2077_v63 = vpop.f32.mrb[57].mxu0 }
 0x516   : > { %v2116_v19 = vadd.f32 %v2077_v63, %v1963_v58  ;;  %v2657_v28 = vpop.f32.mrb[58].mxu0 }
 0x517   : > { %2134 = vst [vmem:[%s3094_s20 + $0x50] sm:$0xff] %v2118_v26  ;;  %v2119_v22 = vadd.f32 %v2657_v28, %v1966_v3  ;;  %v2080_v4 = vpop.f32.mrb[59].mxu0 }
 0x518   : > { %2132 = vst [vmem:[%s3094_s20 + $0x40] sm:$0xff] %v2116_v19  ;;  %v2117_v12 = vadd.f32 %v2080_v4, %v1964_v31 }
 0x519   : > { %2135 = vst [vmem:[%s3094_s20 + $0x58] sm:$0xff] %v2119_v22 }
 0x51a   : > { %2133 = vst [vmem:[%s3094_s20 + $0x48] sm:$0xff] %v2117_v12 }
 0x51c   : > { %v2660_v14 = vpop.f32.mrb[60].mxu0 }
 0x51d   : > { %v2122_v17 = vadd.f32 %v2660_v14, %v1969_v36  ;;  %v2093_v40 = vpop.f32.mrb[61].mxu0 }
 0x51e   : > { %v2120_v10 = vadd.f32 %v2093_v40, %v1967_v18  ;;  %v2661_v38 = vpop.f32.mrb[62].mxu0 }
 0x51f   : > { %2138 = vst [vmem:[%s3094_s20 + $0x70] sm:$0xff] %v2122_v17  ;;  %v2123_v11 = vadd.f32 %v2661_v38, %v1970_v15  ;;  %v2096_v35 = vpop.f32.mrb[63].mxu0 }
 0x520   : > { %2136 = vst [vmem:[%s3094_s20 + $0x60] sm:$0xff] %v2120_v10  ;;  %v2121_v47 = vadd.f32 %v2096_v35, %v1968_v6 }
 0x521   : > { %2139 = vst [vmem:[%s3094_s20 + $0x78] sm:$0xff] %v2123_v11 }
 0x522   : > { %2137 = vst [vmem:[%s3094_s20 + $0x68] sm:$0xff] %v2121_v47 }
 0x523   : > { %2835 = shalt.err (!%p2832_p8)
}
 0x524   : > { %s2836_s20 = scalar_lea.hbm %s3591_s13, 2048  ;;  %s2840_s10 = scalar_lea.hbm %s3694_s29, 4096 }
 0x525   : > { %p2837_p10 = scmp.ne.s32.totalorder %s3591_s13, %s2836_s20  ;;  %p2841_p13 = scmp.lt.u32.totalorder %s3591_s13, %s3694_s29 }
 0x526   : > { %p2842_p0 = scmp.lt.u32.totalorder %s2840_s10, %s2836_s20  ;;  %p2844_p2 = scmp.lt.u32.totalorder %s2836_s20, %s3591_s13 }
 0x527   : > { %p2838_p11 = pnand %p2837_p10, %p3027_p3 }
 0x528   : > { %p2843_p1 = por %p2842_p0, %p2841_p13 }
 0x529   : > { %p2839_p12 = pneg %p2838_p11 }
 0x52a   : > { %p2845_p4 = por %p2844_p2, %p2843_p1 }
 0x52c   : > { %p2846_p5 = pnand %p2845_p4, %p2839_p12 }
 0x52e   : > { %2849 = shalt.err (!%p2846_p5)
}
 0x52f   : > { %s2921_s27 = smov 128   ;;  %s2922_s22 = smov 8  }
 0x530   : > { %2670 = dma.vmem_to_hbm [thread:$0]  (%p3027_p3), %s3593_s21, 2048, %s3591_s13, %s3600_s23, %s2921_s27, %s2921_s27, %s2922_s22  }
 0x531 PF: > { %s3696_s28 = sld [smem:[#allocation10_spill]]  ;;  %s3697_s2 = sld [smem:[#allocation6_spill]] }
 0x537   : > { %p2676_p6 = scmp.ge.s32.totalorder %s3696_s28, 2  ;;  %s2170_s15 = sand.u32 1, %s3697_s2  }
 0x538   : > { %s2171_s17 = scalar_lea.sflag [#allocation4], %s2170_s15 }
 0x539   : > { %p2673_p7 = pnand %p2676_p6, %p3037_p9 }
 0x53b   : > { %2883 = dma.done.wait (!%p2673_p7), %s2171_s17, 2048  }
 0x53c   : > { %2885 = vsyncadd (!%p2673_p7), %s2171_s17, 4294965248  ;;  %s23_s20 = sadd.s32 1, %s3696_s28   ;;  %s3699_s25 = sld [smem:[#allocation7_spill]] }
 0x53d   : > { %p20_p8 = scmp.ge.s32.totalorder %s23_s20, 10   ;;  %s3700_s15 = sld [smem:[#allocation15_spill]] }
 0x53e   : > { %s3701_s16 = sld [smem:[#allocation8_spill]]  ;;  %s3702_s17 = sld [smem:[#allocation9_spill]] }
 0x53f   : > { %s3703_s18 = sld [smem:[#allocation11_spill]]  ;;  %s3704_s19 = sld [smem:[#allocation13_spill]] }
 0x540   : > { %s3705_s13 = smov %s2892_s14  ;;  %22 = sbr.rel (!%p20_p8) target bundleno = 9 (0x9), region = 120 }
 0x542   : > { %s3706_s14 = smov %s3699_s25 }
 0x547   :  { %2176 = vsyncpa [#allocation4], 1 }
 0x548   :  { %2178 = vsyncpa [#allocation4 + $0x1], 1 }

</bundles_post_ra>
